<compile_context>
chip_gen: v5e
topology: v5e:2x2
jax: 0.10.0
libtpu: 0.0.40
codegen_flags: <defaults>
</compile_context>

<pallas_src>
import jax
import jax.numpy as jnp
from jax.experimental import pallas as pl
from jax.experimental.pallas import tpu as pltpu

# ---- SKNet config (small, deterministic) --------------------------------
INPLANES = 8                 # C  (PyTorch: inplanes = outplanes)
M = 2                        # number of split branches
G = 4                        # conv groups (C must be divisible by G)
R = 16
L = 32
D = max(INPLANES // R, L)    # = 32  (channelWise bottleneck width)
H = W = 16                   # spatial
HW = H * W                   # 256 -> lane axis inside the kernel
B = 2                        # batch
MAX_DIL = M                  # dilations are 1..M -> pad by M on each side
KTOT = M * 9 * INPLANES      # 144 = contraction size of the fused conv matmul
EPS = 1e-5
HP = jax.lax.Precision.HIGHEST


# ---- Pallas kernel -------------------------------------------------------
def sknet_kernel(patches_ref, wconv_ref, bconv_ref, w1_ref, b1_ref, w2_ref, b2_ref, out_ref):
    C = INPLANES
    patches = patches_ref[0]                               # (KTOT, HW) lane-dense

    # --- split: all M branches x 9 taps as ONE block-diag MXU matmul ---
    conv = jnp.dot(wconv_ref[...], patches,
                   preferred_element_type=jnp.float32, precision=HP)   # (M*C, HW)
    splits = jnp.maximum(conv + bconv_ref[...], 0.0)       # bias is a (M*C,1) broadcast add

    # --- fuse: U = sum_m splits_m ; GAP over the lane axis (XLU reduce) ---
    U = splits[0:C, :]
    for m in range(1, M):
        U = U + splits[m * C:(m + 1) * C, :]
    gap = jnp.sum(U, axis=1, keepdims=True) * (1.0 / float(HW))        # (C, 1)

    h1 = jnp.dot(w1_ref[...], gap, preferred_element_type=jnp.float32,
                 precision=HP) + b1_ref[...]                            # (D, 1)
    h1 = jnp.maximum(h1, 0.0)
    z = jnp.dot(w2_ref[...], h1, preferred_element_type=jnp.float32,
                precision=HP) + b2_ref[...]                             # (M*C, 1)

    # --- select: softmax over the M branches (per channel) ---
    if M == 2:
        # 2-way softmax == sigmoid(z0 - z1); exact division on an (C,1) tile is free.
        e = jnp.exp(z[C:2 * C, :] - z[0:C, :])
        a0 = 1.0 / (1.0 + e)
        V = splits[0:C, :] * a0 + splits[C:2 * C, :] * (1.0 - a0)
    else:
        zmax = z[0:C, :]
        for m in range(1, M):
            zmax = jnp.maximum(zmax, z[m * C:(m + 1) * C, :])
        es = [jnp.exp(z[m * C:(m + 1) * C, :] - zmax) for m in range(M)]
        den = es[0]
        for m in range(1, M):
            den = den + es[m]
        inv = 1.0 / den
        V = splits[0:C, :] * (es[0] * inv)
        for m in range(1, M):
            V = V + splits[m * C:(m + 1) * C, :] * (es[m] * inv)

    out_ref[0] = V.astype(out_ref.dtype)


# ---- wrapper: im2col in plain JAX, lane-dense Pallas call -----------------
def build_patches(x_nchw):
    """im2col for all M dilated branches: (B, M*9*C, H*W), row = m*9*C + (kh*3+kw)*C + ci."""
    Bn, C, Hh, Ww = x_nchw.shape
    xp = jnp.pad(x_nchw, ((0, 0), (0, 0), (MAX_DIL, MAX_DIL), (MAX_DIL, MAX_DIL)))
    rows = []
    for m in range(M):
        dil = 1 + m
        for kh in range(3):
            for kw in range(3):
                oh = MAX_DIL + (kh - 1) * dil
                ow = MAX_DIL + (kw - 1) * dil
                rows.append(xp[:, :, oh:oh + Hh, ow:ow + Ww].reshape(Bn, C, Hh * Ww))
    return jnp.concatenate(rows, axis=1)                   # (B, KTOT, HW)


def sknet_pallas(x_nchw, wconv, bconv, w1, b1, w2, b2):
    Bn, C, Hh, Ww = x_nchw.shape
    hw = Hh * Ww
    patches = build_patches(x_nchw)                        # (B, KTOT, HW)
    out = pl.pallas_call(
        sknet_kernel,
        out_shape=jax.ShapeDtypeStruct((Bn, C, hw), x_nchw.dtype),
        grid=(Bn,),
        in_specs=[
            pl.BlockSpec((1, KTOT, hw), lambda b: (b, 0, 0)),
            pl.BlockSpec((M * C, KTOT), lambda b: (0, 0)),
            pl.BlockSpec((M * C, 1), lambda b: (0, 0)),
            pl.BlockSpec((D, C), lambda b: (0, 0)),
            pl.BlockSpec((D, 1), lambda b: (0, 0)),
            pl.BlockSpec((M * C, D), lambda b: (0, 0)),
            pl.BlockSpec((M * C, 1), lambda b: (0, 0)),
        ],
        out_specs=pl.BlockSpec((1, C, hw), lambda b: (b, 0, 0)),
        compiler_params=pltpu.CompilerParams(dimension_semantics=("parallel",)),
    )(patches, wconv, bconv, w1, b1, w2, b2)
    return out.reshape(Bn, C, Hh, Ww)                      # back to NCHW (PyTorch layout)


# ---- deterministic parameter init (PyTorch shapes) -----------------------
def init_params(key):
    C = INPLANES
    ks = jax.random.split(key, 20)
    p = {}
    p['conv_w'] = [0.01 * jax.random.normal(ks[i], (C, C // G, 3, 3), jnp.float32) for i in range(M)]
    p['conv_b'] = [0.01 * jax.random.normal(ks[2 + i], (C,), jnp.float32) for i in range(M)]
    p['bn_g'] = [1.0 + 0.1 * jax.random.normal(ks[4 + i], (C,), jnp.float32) for i in range(M)]
    p['bn_b'] = [0.05 * jax.random.normal(ks[6 + i], (C,), jnp.float32) for i in range(M)]
    p['bn_m'] = [0.01 * jax.random.normal(ks[8 + i], (C,), jnp.float32) for i in range(M)]
    p['bn_v'] = [0.5 + jax.random.uniform(ks[10 + i], (C,), jnp.float32) for i in range(M)]
    p['fc1_w'] = 0.01 * jax.random.normal(ks[12], (D, C), jnp.float32)
    p['fc1_b'] = 0.01 * jax.random.normal(ks[13], (D,), jnp.float32)
    p['fc1_bn_g'] = 1.0 + 0.1 * jax.random.normal(ks[14], (D,), jnp.float32)
    p['fc1_bn_b'] = 0.05 * jax.random.normal(ks[15], (D,), jnp.float32)
    p['fc1_bn_m'] = 0.01 * jax.random.normal(ks[16], (D,), jnp.float32)
    p['fc1_bn_v'] = 0.5 + jax.random.uniform(ks[17], (D,), jnp.float32)
    p['fc2_w'] = 0.01 * jax.random.normal(ks[18], (M * INPLANES, D), jnp.float32)
    p['fc2_b'] = 0.01 * jax.random.normal(ks[19], (M * INPLANES,), jnp.float32)
    return p


# ---- glue: fold eval-mode BN + build the block-diagonal fused conv weight --
def fold_params(p):
    C = INPLANES
    cg = C // G
    eye = jnp.eye(G, dtype=jnp.float32)
    wbig = jnp.zeros((M * C, KTOT), jnp.float32)
    bvec = []
    for m in range(M):
        scale = p['bn_g'][m] / jnp.sqrt(p['bn_v'][m] + EPS)            # (C,)
        w_eff = p['conv_w'][m] * scale[:, None, None, None]            # (C, C//G, 3, 3)
        b_eff = (p['conv_b'][m] - p['bn_m'][m]) * scale + p['bn_b'][m]
        bvec.append(b_eff)
        # grouped weight -> dense block-diagonal (C_out, C_in, 3, 3)
        wg = w_eff.reshape(G, cg, cg, 3, 3)                            # (g, o, i, kh, kw)
        dense = jnp.einsum('gh,goikl->gohikl', eye, wg).reshape(C, C, 3, 3)
        # rows = co, cols = (kh*3+kw)*C + ci   (matches build_patches ordering)
        blk = jnp.transpose(dense, (0, 2, 3, 1)).reshape(C, 9 * C)
        wbig = wbig.at[m * C:(m + 1) * C, m * 9 * C:(m + 1) * 9 * C].set(blk)
    bconv = jnp.concatenate(bvec).reshape(M * C, 1)

    s1 = p['fc1_bn_g'] / jnp.sqrt(p['fc1_bn_v'] + EPS)
    w1 = p['fc1_w'] * s1[:, None]                                      # (D, C)
    b1 = ((p['fc1_b'] - p['fc1_bn_m']) * s1 + p['fc1_bn_b']).reshape(D, 1)
    w2 = p['fc2_w']                                                    # (M*C, D)
    b2 = p['fc2_b'].reshape(M * C, 1)
    return wbig, bconv, w1, b1, w2, b2


# ---- pure-JAX reference (mirrors PyTorch forward exactly, NCHW) -----------
def sknet_reference(x_nchw, p):
    Bn = x_nchw.shape[0]
    C = INPLANES
    splits = []
    for m in range(M):
        dil = 1 + m
        y = jax.lax.conv_general_dilated(
            x_nchw, p['conv_w'][m], window_strides=(1, 1),
            padding=[(dil, dil), (dil, dil)], rhs_dilation=(dil, dil),
            dimension_numbers=('NCHW', 'OIHW', 'NCHW'),
            feature_group_count=G, precision=HP)
        y = y + p['conv_b'][m][None, :, None, None]
        y = ((y - p['bn_m'][m][None, :, None, None])
             / jnp.sqrt(p['bn_v'][m] + EPS)[None, :, None, None]
             * p['bn_g'][m][None, :, None, None]
             + p['bn_b'][m][None, :, None, None])
        splits.append(jnp.maximum(y, 0.0))
    U = splits[0]
    for m in range(1, M):
        U = U + splits[m]
    gap = jnp.mean(U, axis=(2, 3))                                     # (B, C)
    h = gap @ p['fc1_w'].T + p['fc1_b']
    h = (h - p['fc1_bn_m']) / jnp.sqrt(p['fc1_bn_v'] + EPS) * p['fc1_bn_g'] + p['fc1_bn_b']
    h = jnp.maximum(h, 0.0)
    z = h @ p['fc2_w'].T + p['fc2_b']                                  # (B, M*C)
    a = jax.nn.softmax(z.reshape(Bn, M, C), axis=1)                    # softmax over M
    V = jnp.zeros_like(splits[0])
    for m in range(M):
        V = V + splits[m] * a[:, m][:, :, None, None]
    return V


if __name__ == "__main__":
    key = jax.random.PRNGKey(0)
    kx, kp = jax.random.split(key)

    # PyTorch-convention input: NCHW (already channel-major == lane-dense HW)
    x_nchw = jax.random.normal(kx, (B, INPLANES, H, W), jnp.float32)

    params = init_params(kp)
    wconv, bconv, w1, b1, w2, b2 = fold_params(params)

    out_nchw = sknet_pallas(x_nchw, wconv, bconv, w1, b1, w2, b2)
    out_nchw = jax.block_until_ready(out_nchw)

    ref_nchw = sknet_reference(x_nchw, params)
    err = float(jnp.max(jnp.abs(out_nchw - ref_nchw)))
    assert err < 1e-4, f"max abs diff vs reference: {err}"
    print("KERNEL_OK")
</pallas_src>

<mosaic_0001>
module attributes {stable_mosaic.version = 11 : i64} {
  func.func @sknet_kernel(%arg0: i32, %arg1: memref<1x144x256xf32, #tpu.memory_space<vmem>>, %arg2: memref<16x144xf32, #tpu.memory_space<vmem>>, %arg3: memref<16x1xf32, #tpu.memory_space<vmem>>, %arg4: memref<32x8xf32, #tpu.memory_space<vmem>>, %arg5: memref<32x1xf32, #tpu.memory_space<vmem>>, %arg6: memref<16x32xf32, #tpu.memory_space<vmem>>, %arg7: memref<16x1xf32, #tpu.memory_space<vmem>>, %arg8: memref<1x8x256xf32, #tpu.memory_space<vmem>>) attributes {dimension_semantics = [#tpu.dimension_semantics<parallel>], iteration_bounds = array<i64: 2>, scalar_prefetch = 0 : i64, scratch_operands = 0 : i64, tpu.core_type = #tpu.core_type<tc>, window_params = [{transform_indices = @transform_0, window_bounds = array<i64: 1, 144, 256>}, {pipeline_mode = #tpu.pipeline_mode<synchronous>, transform_indices = @transform_1, window_bounds = array<i64: 16, 144>}, {pipeline_mode = #tpu.pipeline_mode<synchronous>, transform_indices = @transform_2, window_bounds = array<i64: 16, 1>}, {pipeline_mode = #tpu.pipeline_mode<synchronous>, transform_indices = @transform_3, window_bounds = array<i64: 32, 8>}, {pipeline_mode = #tpu.pipeline_mode<synchronous>, transform_indices = @transform_4, window_bounds = array<i64: 32, 1>}, {pipeline_mode = #tpu.pipeline_mode<synchronous>, transform_indices = @transform_5, window_bounds = array<i64: 16, 32>}, {pipeline_mode = #tpu.pipeline_mode<synchronous>, transform_indices = @transform_6, window_bounds = array<i64: 16, 1>}, {transform_indices = @transform_7, window_bounds = array<i64: 1, 8, 256>}]} {
    %c0 = arith.constant 0 : index
    %c0_0 = arith.constant 0 : index
    %c0_1 = arith.constant 0 : index
    %0 = vector.load %arg1[%c0, %c0_0, %c0_1] : memref<1x144x256xf32, #tpu.memory_space<vmem>>, vector<1x144x256xf32>
    %1 = vector.shape_cast %0 : vector<1x144x256xf32> to vector<144x256xf32>
    %c0_2 = arith.constant 0 : index
    %c0_3 = arith.constant 0 : index
    %2 = vector.load %arg2[%c0_2, %c0_3] : memref<16x144xf32, #tpu.memory_space<vmem>>, vector<16x144xf32>
    %cst = arith.constant dense<0.000000e+00> : vector<16x256xf32>
    %3 = tpu.matmul %2, %1, %cst {dimension_numbers = #tpu.dot_dimension_numbers<[1], [0], [0], [1], [0, 0, 1, 1], [], []>, precision = #tpu.contract_precision<fp32>} : vector<16x144xf32>, vector<144x256xf32>, vector<16x256xf32> -> vector<16x256xf32>
    %c0_4 = arith.constant 0 : index
    %c0_5 = arith.constant 0 : index
    %4 = vector.load %arg3[%c0_4, %c0_5] : memref<16x1xf32, #tpu.memory_space<vmem>>, vector<16x1xf32>
    %5 = vector.broadcast %4 : vector<16x1xf32> to vector<16x256xf32>
    %6 = arith.addf %3, %5 : vector<16x256xf32>
    %cst_6 = arith.constant 0.000000e+00 : f32
    %7 = vector.broadcast %cst_6 : f32 to vector<16x256xf32>
    %8 = arith.maximumf %6, %7 : vector<16x256xf32>
    %9 = vector.extract_strided_slice %8 {offsets = [0, 0], sizes = [8, 256], strides = [1, 1]} : vector<16x256xf32> to vector<8x256xf32>
    %10 = vector.extract_strided_slice %8 {offsets = [8, 0], sizes = [8, 256], strides = [1, 1]} : vector<16x256xf32> to vector<8x256xf32>
    %11 = arith.addf %9, %10 : vector<8x256xf32>
    %cst_7 = arith.constant dense<0.000000e+00> : vector<8xf32>
    %12 = vector.multi_reduction <add>, %11, %cst_7 [1] : vector<8x256xf32> to vector<8xf32>
    %13 = vector.shape_cast %12 : vector<8xf32> to vector<8x1xf32>
    %cst_8 = arith.constant 3.906250e-03 : f32
    %14 = vector.broadcast %cst_8 : f32 to vector<8x1xf32>
    %15 = arith.mulf %13, %14 : vector<8x1xf32>
    %c0_9 = arith.constant 0 : index
    %c0_10 = arith.constant 0 : index
    %16 = vector.load %arg4[%c0_9, %c0_10] : memref<32x8xf32, #tpu.memory_space<vmem>>, vector<32x8xf32>
    %cst_11 = arith.constant dense<0.000000e+00> : vector<32x1xf32>
    %17 = tpu.matmul %16, %15, %cst_11 {dimension_numbers = #tpu.dot_dimension_numbers<[1], [0], [0], [1], [0, 0, 1, 1], [], []>, precision = #tpu.contract_precision<fp32>} : vector<32x8xf32>, vector<8x1xf32>, vector<32x1xf32> -> vector<32x1xf32>
    %c0_12 = arith.constant 0 : index
    %c0_13 = arith.constant 0 : index
    %18 = vector.load %arg5[%c0_12, %c0_13] : memref<32x1xf32, #tpu.memory_space<vmem>>, vector<32x1xf32>
    %19 = arith.addf %17, %18 : vector<32x1xf32>
    %cst_14 = arith.constant 0.000000e+00 : f32
    %20 = vector.broadcast %cst_14 : f32 to vector<32x1xf32>
    %21 = arith.maximumf %19, %20 : vector<32x1xf32>
    %c0_15 = arith.constant 0 : index
    %c0_16 = arith.constant 0 : index
    %22 = vector.load %arg6[%c0_15, %c0_16] : memref<16x32xf32, #tpu.memory_space<vmem>>, vector<16x32xf32>
    %cst_17 = arith.constant dense<0.000000e+00> : vector<16x1xf32>
    %23 = tpu.matmul %22, %21, %cst_17 {dimension_numbers = #tpu.dot_dimension_numbers<[1], [0], [0], [1], [0, 0, 1, 1], [], []>, precision = #tpu.contract_precision<fp32>} : vector<16x32xf32>, vector<32x1xf32>, vector<16x1xf32> -> vector<16x1xf32>
    %c0_18 = arith.constant 0 : index
    %c0_19 = arith.constant 0 : index
    %24 = vector.load %arg7[%c0_18, %c0_19] : memref<16x1xf32, #tpu.memory_space<vmem>>, vector<16x1xf32>
    %25 = arith.addf %23, %24 : vector<16x1xf32>
    %26 = vector.extract_strided_slice %25 {offsets = [8, 0], sizes = [8, 1], strides = [1, 1]} : vector<16x1xf32> to vector<8x1xf32>
    %27 = vector.extract_strided_slice %25 {offsets = [0, 0], sizes = [8, 1], strides = [1, 1]} : vector<16x1xf32> to vector<8x1xf32>
    %28 = arith.subf %26, %27 : vector<8x1xf32>
    %29 = math.exp %28 : vector<8x1xf32>
    %cst_20 = arith.constant 1.000000e+00 : f32
    %30 = vector.broadcast %cst_20 : f32 to vector<8x1xf32>
    %31 = arith.addf %30, %29 : vector<8x1xf32>
    %cst_21 = arith.constant 1.000000e+00 : f32
    %32 = vector.broadcast %cst_21 : f32 to vector<8x1xf32>
    %33 = arith.divf %32, %31 : vector<8x1xf32>
    %34 = vector.extract_strided_slice %8 {offsets = [0, 0], sizes = [8, 256], strides = [1, 1]} : vector<16x256xf32> to vector<8x256xf32>
    %35 = vector.broadcast %33 : vector<8x1xf32> to vector<8x256xf32>
    %36 = arith.mulf %34, %35 : vector<8x256xf32>
    %37 = vector.extract_strided_slice %8 {offsets = [8, 0], sizes = [8, 256], strides = [1, 1]} : vector<16x256xf32> to vector<8x256xf32>
    %cst_22 = arith.constant 1.000000e+00 : f32
    %38 = vector.broadcast %cst_22 : f32 to vector<8x1xf32>
    %39 = arith.subf %38, %33 : vector<8x1xf32>
    %40 = vector.broadcast %39 : vector<8x1xf32> to vector<8x256xf32>
    %41 = arith.mulf %37, %40 : vector<8x256xf32>
    %42 = arith.addf %36, %41 : vector<8x256xf32>
    %c0_23 = arith.constant 0 : index
    %c0_24 = arith.constant 0 : index
    %c0_25 = arith.constant 0 : index
    %43 = vector.load %arg8[%c0_23, %c0_24, %c0_25] : memref<1x8x256xf32, #tpu.memory_space<vmem>>, vector<1x8x256xf32>
    %44 = vector.shape_cast %43 : vector<1x8x256xf32> to vector<8x256xf32>
    %45 = vector.shape_cast %42 : vector<8x256xf32> to vector<1x8x256xf32>
    tpu.vector_store %arg8[%c0_23, %c0_24, %c0_25], %45 {strides = array<i32>} : memref<1x8x256xf32, #tpu.memory_space<vmem>>, vector<1x8x256xf32>,
    return
  }
  func.func @transform_0(%arg0: i32) -> (i32, i32, i32) {
    %c0_i32 = arith.constant 0 : i32
    %c0_i32_0 = arith.constant 0 : i32
    %c0_i32_1 = arith.constant 0 : i32
    return %arg0, %c0_i32, %c0_i32_0 : i32, i32, i32
  }
  func.func @transform_1(%arg0: i32) -> (i32, i32) {
    %c0_i32 = arith.constant 0 : i32
    %c0_i32_0 = arith.constant 0 : i32
    %c0_i32_1 = arith.constant 0 : i32
    return %c0_i32, %c0_i32_0 : i32, i32
  }
  func.func @transform_2(%arg0: i32) -> (i32, i32) {
    %c0_i32 = arith.constant 0 : i32
    %c0_i32_0 = arith.constant 0 : i32
    %c0_i32_1 = arith.constant 0 : i32
    return %c0_i32, %c0_i32_0 : i32, i32
  }
  func.func @transform_3(%arg0: i32) -> (i32, i32) {
    %c0_i32 = arith.constant 0 : i32
    %c0_i32_0 = arith.constant 0 : i32
    %c0_i32_1 = arith.constant 0 : i32
    return %c0_i32, %c0_i32_0 : i32, i32
  }
  func.func @transform_4(%arg0: i32) -> (i32, i32) {
    %c0_i32 = arith.constant 0 : i32
    %c0_i32_0 = arith.constant 0 : i32
    %c0_i32_1 = arith.constant 0 : i32
    return %c0_i32, %c0_i32_0 : i32, i32
  }
  func.func @transform_5(%arg0: i32) -> (i32, i32) {
    %c0_i32 = arith.constant 0 : i32
    %c0_i32_0 = arith.constant 0 : i32
    %c0_i32_1 = arith.constant 0 : i32
    return %c0_i32, %c0_i32_0 : i32, i32
  }
  func.func @transform_6(%arg0: i32) -> (i32, i32) {
    %c0_i32 = arith.constant 0 : i32
    %c0_i32_0 = arith.constant 0 : i32
    %c0_i32_1 = arith.constant 0 : i32
    return %c0_i32, %c0_i32_0 : i32, i32
  }
  func.func @transform_7(%arg0: i32) -> (i32, i32, i32) {
    %c0_i32 = arith.constant 0 : i32
    %c0_i32_0 = arith.constant 0 : i32
    %c0_i32_1 = arith.constant 0 : i32
    return %arg0, %c0_i32, %c0_i32_0 : i32, i32, i32
  }
}

</mosaic_0001>

<bundles_post_ra>
// kernel: tpu_custom_call.1
= control target key start
LH: loop header
LB: loop body
LE: loop exit
PB: predicated region body
PF: predicated region fallthrough
CT: control target
= control target key end

     0   :  { %12 = vsyncpa [#allocation3], 0  ;;  %s3193_s0 = inlined_call_operand.hbm [shape: f32[2,144,256], index: 0, kind: input, shape index: {}]   ;;  %s3194_s1 = inlined_call_operand.vmem [shape: f32[16,144], index: 1, kind: input, shape index: {}]   ;;  %s3195_s2 = inlined_call_operand.vmem [shape: f32[16,1], index: 2, kind: input, shape index: {}]   ;;  %s3196_s3 = inlined_call_operand.vmem [shape: f32[32,8], index: 3, kind: input, shape index: {}]   ;;  %s3197_s4 = inlined_call_operand.vmem [shape: f32[32,1], index: 4, kind: input, shape index: {}]   ;;  %s3198_s5 = inlined_call_operand.vmem [shape: f32[16,32], index: 5, kind: input, shape index: {}]   ;;  %s3199_s6 = inlined_call_operand.vmem [shape: f32[16,1], index: 6, kind: input, shape index: {}]   ;;  %s3200_s7 = inlined_call_operand.hbm [shape: f32[2,8,256], index: 7, kind: output, shape index: {}]  }
   0x1   :  { %14 = vsyncpa [#allocation3 + $0x1], 0 }
   0x2   :  { %15 = vsyncpa [#allocation4], 0 }
   0x3   :  { %17 = vsyncpa [#allocation4 + $0x1], 0  ;;  %s2324_s24 = smov 0   ;;  %s2326_s25 = smov 0  }
   0x4   :  { %s2328_s26 = smov 0   ;;  %s2330_s27 = smov 0  }
   0x5 LB: > { %3220 = sst [smem:[#allocation8_spill]] %s2275_s26  ;;  %s2345_s28 = sadd.s32 4294967295, %s2279_s27   ;;  %s2279_s27 = sphi %s2330_s27, %s3257_s27   ;;  %s2275_s26 = sphi %s2328_s26, %s3254_s26   ;;  %s2271_s25 = sphi %s2326_s25, %s3256_s25   ;;  %s2267_s24 = sphi %s2324_s24, %s3255_s24  }
   0x6   : > { %s2108_s29 = sadd.s32 4294967294, %s2279_s27   ;;  %s2349_s30 = sadd.s32 1, %s2279_s27  }
   0x7   : > { %s30_s8 = sadd.s32 1, %s2275_s26  ;;  %s27_s9 = ssub.s32 %s2279_s27, %s2349_s30 }
   0x8   : > { %p37_p0 = scmp.ne.s32.totalorder %s2275_s26, %s2271_s25  ;;  %p28_p1 = scmp.eq.s32.totalorder %s27_s9, 0 }
   0x9   : > { %p38_p2 = scmp.eq.s32.totalorder %s2279_s27, 0  ;;  %p43_p3 = scmp.ne.s32.totalorder %s2271_s25, %s2267_s24 }
   0xa   : > { %p44_p4 = scmp.eq.s32.totalorder %s2345_s28, 0  ;;  %p193_p7 = scmp.eq.s32.totalorder %s2345_s28, 1 }
   0xb   : > { %s2361_s10 = scalar_select %p28_p1, %s2275_s26, %s30_s8  }
   0xc   : > { %p39_p5 = por %p38_p2, %p37_p0  ;;  %p2363_p6 = por %p44_p4, %p43_p3 }
   0xd   : > { %3221 = sst [smem:[#allocation9_spill]] %s2361_s10  ;;  %p199_p8 = scmp.eq.s32.totalorder %s2108_s29, 1 }
   0xe   : > { %p2110_p9 = scmp.ge.s32.totalorder %s2279_s27, 2  ;;  %p2139_p10 = scmp.lt.s32.totalorder %s2279_s27, 2 }
   0xf   : > { %p2370_p11 = por %p193_p7, %p37_p0  ;;  %p2374_p12 = por %p199_p8, %p43_p3 }
  0x10   : > { %s237_s14 = sand.u32 1, %s2275_s26   ;;  %s2125_s15 = smul.u32 288, %s2279_s27 }
  0x11   : > { %s2124_s16 = smul.u32 288, %s237_s14  ;;  %p2383_p13 = pnand %p2139_p10, %p39_p5 }
  0x12   : > { %s246_s19 = scalar_lea.hbm %s3193_s0, %s2125_s15  ;;  %s238_s29 = scalar_lea.sflag [#allocation3], %s237_s14 }
  0x13   : > { %s247_s21 = sshll.u32 %s246_s19, 4  ;;  %s241_s22 = scalar_lea.vmem [#allocation2], %s2124_s16  ;;  %s248_s21 = int_to_ptr.hbm [resolvable:$true] %s247_s21 }
  0x14   : > { %s249_s23 = sshll.u32 %s241_s22, 4  ;;  %s2183_s8 = sshra.s32 %s248_s21, 4  ;;  %s250_s23 = int_to_ptr.vmem [resolvable:$true] %s249_s23  ;;  %s2184_s8 = int_to_ptr.hbm [resolvable:$true] %s2183_s8 }
  0x15   : > { %s2185_s9 = scalar_lea.hbm %s2184_s8, 288  ;;  %p2187_p1 = pneg %p2383_p13 }
  0x16   : > { %p2186_p0 = scmp.ne.s32.totalorder %s2184_s8, %s2185_s9  ;;  %s2190_s18 = scalar_lea.hbm %s3193_s0, 576 }
  0x17   : > { %p2191_p4 = scmp.lt.s32.totalorder %s2184_s8, %s3193_s0  ;;  %p2192_p5 = scmp.lt.s32.totalorder %s2190_s18, %s2185_s9 }
  0x18   : > { %p2188_p2 = pnand %p2187_p1, %p2186_p0 }
  0x19   : > { %p2193_p7 = por %p2192_p5, %p2191_p4 }
  0x1a   : > { %p2189_p3 = pneg %p2188_p2 }
  0x1c   : > { %p2194_p8 = pnand %p2193_p7, %p2189_p3 }
  0x1e   : > { %2197 = shalt.err (!%p2194_p8)
}
  0x1f   : > { %s2281_s14 = smov 256   ;;  %s2282_s16 = smov 16  }
  0x20   : > { %2134 = dma.hbm_to_vmem [thread:$0]  (!%p2383_p13), %s248_s21, 4608, %s250_s23, %s238_s29, %s2281_s14, %s2281_s14, %s2282_s16  }
  0x21   : > { %p2112_p10 = scmp.ge.s32.totalorder %s2279_s27, 1  ;;  %p257_p0 = scmp.lt.s32.totalorder %s2279_s27, 3 }
  0x23   : > { %p258_p1 = pnand %p2112_p10, %p257_p0 }
  0x25   : > { %261 = sbr.rel (%p258_p1) target bundleno = 996 (0x3e4), region = 48 }
  0x2a   : > { %s2400_s19 = sand.u32 1, %s2271_s25  }
  0x2b   : > { %s2126_s26 = smul.u32 288, %s2400_s19  ;;  %s264_s10 = scalar_lea.sflag [#allocation3], %s2400_s19 }
  0x2d   : > { %s2404_s22 = scalar_lea.vmem [#allocation2], %s2126_s26 }
  0x2e   : > { %2258 = dma.done.wait (%p2363_p6), %s264_s10, 4608  }
  0x2f   : > { %2260 = vsyncadd (%p2363_p6), %s264_s10, 4294962688  ;;  %v329_v0 = vld [vmem:[%s2404_s22 + $0xf0] sm:$0xff]  ;;  %v327_v1 = vld [vmem:[%s2404_s22 + $0xe0] sm:$0xff]  ;;  %vm351_vm0 = vcmask 130048   ;;  %vm1500_vm1 = vcmask 64512   ;;  %vm1760_vm2 = vcmask 261120  }
  0x30   : > { %v325_v2 = vld [vmem:[%s2404_s22 + $0xd0] sm:$0xff]  ;;  %v2413_v3 = vand.u32 4294901760, %v329_v0  ;;  %v2415_v4 = vand.u32 4294901760, %v327_v1  ;;  %v323_v6 = vld [vmem:[%s2404_s22 + $0xc0] sm:$0xff]  ;;  %s2113_s9 = sshll.u32 %s2400_s19, 4  ;;  %s2119_s15 = sshll.u32 %s2345_s28, 4 }
  0x31   : > { %v2417_v5 = vand.u32 4294901760, %v325_v2  ;;  %v321_v7 = vld [vmem:[%s2404_s22 + $0xb0] sm:$0xff]  ;;  %v319_v8 = vld [vmem:[%s2404_s22 + $0xa0] sm:$0xff]  ;;  %v2422_v9 = vand.u32 4294901760, %v323_v6  ;;  %s2033_s14 = scalar_lea.hbm %s3200_s7, %s2119_s15  ;;  %s298_s28 = scalar_lea.vmem [#allocation5], %s2113_s9 }
  0x32   : > { %v2424_v10 = vand.u32 4294901760, %v321_v7  ;;  %v2426_v11 = vand.u32 4294901760, %v319_v8  ;;  %v317_v12 = vld [vmem:[%s2404_s22 + $0x90] sm:$0xff]  ;;  %v315_v13 = vld [vmem:[%s2404_s22 + $0x80] sm:$0xff]  ;;  %359 = vmatpush.msra.mxu0 %v2413_v3  ;;  %v2432_v14 = vsub.f32 %v329_v0, %v2413_v3  ;;  %v2435_v15 = vsub.f32 %v327_v1, %v2415_v4  ;;  %572 = vmatpush.msra.mxu3 %v2413_v3  ;;  %s2035_s16 = sshll.u32 %s298_s28, 4  ;;  %s2037_s26 = sshll.u32 %s2033_s14, 4  ;;  %s2036_s16 = int_to_ptr.vmem [resolvable:$true] %s2035_s16  ;;  %s2038_s26 = int_to_ptr.hbm [resolvable:$true] %s2037_s26 }
  0x33   : > { %v2439_v16 = vsub.f32 %v325_v2, %v2417_v5  ;;  %v2441_v17 = vand.u32 4294901760, %v317_v12  ;;  %v313_v18 = vld [vmem:[%s2404_s22 + $0x70] sm:$0xff]  ;;  %v2445_v19 = vsub.f32 %v323_v6, %v2422_v9  ;;  %v2450_v21 = vand.u32 4294901760, %v315_v13  ;;  %v311_v26 = vld [vmem:[%s2404_s22 + $0x60] sm:$0xff]  ;;  %s2022_s10 = scalar_lea.sflag [#allocation4], %s2400_s19  ;;  %s2233_s23 = scalar_lea.hbm %s3200_s7, 32 }
  0x34   : > { %v2448_v20 = vsub.f32 %v321_v7, %v2424_v10  ;;  %361 = vmatpush.msra.mxu0 %v2415_v4  ;;  %514 = vmatpush.msra.mxu2 %v2432_v14  ;;  %v409_v22 = vand.u32 4294901760, %v2432_v14  ;;  %v415_v23 = vand.u32 4294901760, %v2435_v15  ;;  %v2458_v25 = vsub.f32 %v319_v8, %v2426_v11  ;;  %v309_v36 = vld [vmem:[%s2404_s22 + $0x50] sm:$0xff]  ;;  %v307_v41 = vld [vmem:[%s2404_s22 + $0x40] sm:$0xff] }
  0x35   : > { %v421_v24 = vand.u32 4294901760, %v2439_v16  ;;  %574 = vmatpush.msra.mxu3 %v2415_v4  ;;  %v427_v27 = vand.u32 4294901760, %v2445_v19  ;;  %v2464_v28 = vsub.f32 %v317_v12, %v2441_v17  ;;  %v2466_v29 = vand.u32 4294901760, %v313_v18  ;;  %v305_v49 = vld [vmem:[%s2404_s22 + $0x30] sm:$0xff]  ;;  %v303_v54 = vld [vmem:[%s2404_s22 + $0x20] sm:$0xff] }
  0x36   : > { %363 = vmatpush.msra.mxu0 %v2417_v5  ;;  %517 = vmatpush.msra.mxu2 %v2435_v15  ;;  %v410_v30 = vsub.f32 %v2432_v14, %v409_v22  ;;  %v416_v31 = vsub.f32 %v2435_v15, %v415_v23  ;;  %v433_v33 = vand.u32 4294901760, %v2448_v20  ;;  %v2482_v34 = vsub.f32 %v315_v13, %v2450_v21  ;;  %v301_v59 = vld [vmem:[%s2404_s22 + $0x10] sm:$0xff]  ;;  %v335_v62 = vld [vmem:[%s3194_s1] sm:$0xff]  ;;  %v328_v14 = vld [vmem:[%s2404_s22 + $0xe8] sm:$0xff] }
  0x37   : > { %v422_v32 = vsub.f32 %v2439_v16, %v421_v24  ;;  %576 = vmatpush.msra.mxu3 %v2417_v5  ;;  %v2484_v35 = vand.u32 4294901760, %v311_v26  ;;  %v428_v39 = vsub.f32 %v2445_v19, %v427_v27  ;;  %v439_v40 = vand.u32 4294901760, %v2458_v25  ;;  %v299_v7 = vld [vmem:[%s2404_s22] sm:$0xff]  ;;  %v333_v8 = vld [vmem:[%s2404_s22 + $0x110] sm:$0xff]  ;;  %v326_v15 = vld [vmem:[%s2404_s22 + $0xd8] sm:$0xff] }
  0x38   : > { %365 = vmatpush.msra.mxu0 %v2422_v9  ;;  %520 = vmatpush.msra.mxu2 %v2439_v16  ;;  %v411_v37 = vand.u32 4294901760, %v410_v30  ;;  %v417_v38 = vand.u32 4294901760, %v416_v31  ;;  %v445_v42 = vand.u32 4294901760, %v2464_v28  ;;  %v434_v44 = vsub.f32 %v2448_v20, %v433_v33 }
  0x39   : > { %578 = vmatpush.msra.mxu3 %v2422_v9  ;;  %v423_v43 = vand.u32 4294901760, %v422_v32  ;;  %v2501_v45 = vsub.f32 %v313_v18, %v2466_v29  ;;  %v2503_v46 = vand.u32 4294901760, %v309_v36  ;;  %v2507_v47 = vand.u32 4294901760, %v307_v41 }
  0x3a   : > { %367 = vmatpush.msra.mxu0 %v2424_v10  ;;  %412 = vmatpush.msra.mxu1 %v411_v37  ;;  %v451_v48 = vand.u32 4294901760, %v2482_v34  ;;  %v429_v50 = vand.u32 4294901760, %v428_v39  ;;  %v440_v51 = vsub.f32 %v2458_v25, %v439_v40  ;;  %v2516_v52 = vsub.f32 %v311_v26, %v2484_v35 }
  0x3b   : > { %523 = vmatpush.msra.mxu2 %v2445_v19  ;;  %580 = vmatpush.msra.mxu3 %v2424_v10  ;;  %v446_v53 = vsub.f32 %v2464_v28, %v445_v42  ;;  %v435_v55 = vand.u32 4294901760, %v434_v44  ;;  %v2526_v56 = vsub.f32 %v309_v36, %v2503_v46  ;;  %v2528_v57 = vand.u32 4294901760, %v305_v49 }
  0x3c   : > { %369 = vmatpush.msra.mxu0 %v2426_v11  ;;  %418 = vmatpush.msra.mxu1 %v417_v38  ;;  %v457_v58 = vand.u32 4294901760, %v2501_v45  ;;  %v452_v60 = vsub.f32 %v2482_v34, %v451_v48  ;;  %v2538_v61 = vsub.f32 %v307_v41, %v2507_v47  ;;  %v441_v63 = vand.u32 4294901760, %v440_v51  ;;  %v337_v51 = vld [vmem:[%s3194_s1 + $0x10] sm:$0xff] }
  0x3d   : > { %526 = vmatpush.msra.mxu2 %v2448_v20  ;;  %582 = vmatpush.msra.mxu3 %v2426_v11  ;;  %v2544_v0 = vand.u32 4294901760, %v303_v54  ;;  %v3209_v1 = vand.u32 4294901760, %v2516_v52  ;;  %v447_v2 = vand.u32 4294901760, %v446_v53  ;;  %v2549_v6 = vand.u32 4294901760, %v301_v59 }
  0x3e   : > { %371 = vmatpush.msra.mxu0 %v2441_v17  ;;  %424 = vmatpush.msra.mxu1 %v423_v43  ;;  %v458_v12 = vsub.f32 %v2501_v45, %v457_v58  ;;  %v2558_v13 = vsub.f32 %v305_v49, %v2528_v57  ;;  %v3205_v18 = vand.u32 4294901760, %v2526_v56  ;;  %v2561_v26 = vand.u32 4294901760, %v335_v62 }
  0x3f   : > { %529 = vmatpush.msra.mxu2 %v2458_v25  ;;  %584 = vmatpush.msra.mxu3 %v2441_v17  ;;  %v453_v30 = vand.u32 4294901760, %v452_v60  ;;  %v3204_v31 = vand.u32 4294901760, %v2538_v61  ;;  %v464_v32 = vsub.f32 %v2516_v52, %v3209_v1  ;;  %v2571_v36 = vsub.f32 %v303_v54, %v2544_v0 }
  0x40   : > { %373 = vmatpush.msra.mxu0 %v2450_v21  ;;  %430 = vmatpush.msra.mxu1 %v429_v50  ;;  %v2573_v37 = vand.u32 4294901760, %v299_v7  ;;  %v2575_v38 = vand.u32 4294901760, %v333_v8  ;;  %v2580_v39 = vsub.f32 %v301_v59, %v2549_v6  ;;  %v459_v41 = vand.u32 4294901760, %v458_v12 }
  0x41   : > { %532 = vmatpush.msra.mxu2 %v2464_v28  ;;  %586 = vmatpush.msra.mxu3 %v2450_v21  ;;  %v470_v43 = vsub.f32 %v2526_v56, %v3205_v18  ;;  %v3202_v44 = vand.u32 4294901760, %v2558_v13  ;;  %v2588_v49 = vsub.f32 %v335_v62, %v2561_v26  ;;  %v476_v50 = vsub.f32 %v2538_v61, %v3204_v31  ;;  %v331_v62 = vld [vmem:[%s2404_s22 + $0x100] sm:$0xff] }
  0x42   : > { %375 = vmatpush.msra.mxu0 %v2466_v29  ;;  %436 = vmatpush.msra.mxu1 %v435_v55  ;;  %v465_v53 = vand.u32 4294901760, %v464_v32  ;;  %v2600_v54 = vsub.f32 %v299_v7, %v2573_v37  ;;  %v3203_v55 = vand.u32 4294901760, %v2571_v36  ;;  %v2604_v59 = vsub.f32 %v333_v8, %v2575_v38 }
  0x43   : > { %535 = vmatpush.msra.mxu2 %v2482_v34  ;;  %588 = vmatpush.msra.mxu3 %v2466_v29  ;;  %v3206_v60 = vand.u32 4294901760, %v2580_v39  ;;  %v2615_v7 = vand.u32 4294901760, %v2588_v49  ;;  %v2617_v8 = vand.u32 4294901760, %v337_v51  ;;  %v477_v12 = vand.u32 4294901760, %v476_v50 }
  0x44   : > { %377 = vmatpush.msra.mxu0 %v2484_v35  ;;  %442 = vmatpush.msra.mxu1 %v441_v63  ;;  %v471_v63 = vand.u32 4294901760, %v470_v43  ;;  %v488_v32 = vsub.f32 %v2571_v36, %v3203_v55  ;;  %v2629_v43 = vand.u32 4294901760, %v331_v62  ;;  %v3210_v28 = vmov 0  }
  0x45   : > { %538 = vmatpush.msra.mxu2 %v2501_v45  ;;  %590 = vmatpush.msra.mxu3 %v2484_v35  ;;  %v494_v50 = vsub.f32 %v2580_v39, %v3206_v60  ;;  %v393_v55 = vsub.f32 %v2588_v49, %v2615_v7  ;;  %v2641_v31 = vsub.f32 %v337_v51, %v2617_v8  ;;  %v314_v45 = vld [vmem:[%s2404_s22 + $0x78] sm:$0xff] }
  0x46   : > { %379 = vmatpush.msra.mxu0 %v2503_v46  ;;  %448 = vmatpush.msra.mxu1 %v447_v2  ;;  %v482_v2 = vsub.f32 %v2558_v13, %v3202_v44  ;;  %v3208_v44 = vand.u32 4294901760, %v2604_v59  ;;  %v489_v60 = vand.u32 4294901760, %v488_v32 }
  0x47   : > { %541 = vmatpush.msra.mxu2 %v2516_v52  ;;  %592 = vmatpush.msra.mxu3 %v2503_v46  ;;  %v495_v32 = vand.u32 4294901760, %v494_v50  ;;  %v324_v50 = vld [vmem:[%s2404_s22 + $0xc8] sm:$0xff] }
  0x48   : > { %381 = vmatpush.msra.mxu0 %v2507_v47  ;;  %454 = vmatpush.msra.mxu1 %v453_v30  ;;  %v336_v30 = vld [vmem:[%s3194_s1 + $0x8] sm:$0xff]  ;;  %v782_v51 = vsub.f32 %v2604_v59, %v3208_v44  ;;  %v2666_v44 = vand.u32 4294901760, %v2641_v31  ;;  %v2720_v20 = vand.u32 4294901760, %v324_v50 }
  0x49   : > { %544 = vmatpush.msra.mxu2 %v2526_v56  ;;  %594 = vmatpush.msra.mxu3 %v2507_v47  ;;  %v353_v18 = vsel %vm351_vm0, %v336_v30, 0 }
  0x4a   : > { %383 = vmatpush.msra.mxu0 %v2528_v57  ;;  %460 = vmatpush.msra.mxu1 %v459_v41  ;;  %v3207_v41 = vand.u32 4294901760, %v2600_v54  ;;  %v2659_v30 = vand.u32 4294901760, %v353_v18  ;;  %3226 = vst [vmem:[#allocation10_spill] sm:$0xff] %v2666_v44 }
  0x4b   : > { %547 = vmatpush.msra.mxu2 %v2538_v61  ;;  %596 = vmatpush.msra.mxu3 %v2528_v57 }
  0x4c   : > { %385 = vmatpush.msra.mxu0 %v2544_v0  ;;  %466 = vmatpush.msra.mxu1 %v465_v53  ;;  %v483_v53 = vand.u32 4294901760, %v482_v2  ;;  %v2654_v2 = vsub.f32 %v331_v62, %v2629_v43  ;;  %v783_v62 = vand.u32 4294901760, %v782_v51  ;;  %v322_v51 = vld [vmem:[%s2404_s22 + $0xb8] sm:$0xff] }
  0x4d   : > { %550 = vmatpush.msra.mxu2 %v2558_v13  ;;  %598 = vmatpush.msra.mxu3 %v2544_v0 }
  0x4e   : > { %387 = vmatpush.msra.mxu0 %v2549_v6  ;;  %472 = vmatpush.msra.mxu1 %v471_v63  ;;  %v500_v63 = vsub.f32 %v2600_v54, %v3207_v41  ;;  %v2663_v41 = vand.u32 4294901760, %v393_v55  ;;  %v2680_v55 = vsub.f32 %v353_v18, %v2659_v30  ;;  %v2697_v18 = vand.u32 4294901760, %v326_v15 }
  0x4f   : > { %553 = vmatpush.msra.mxu2 %v2571_v36  ;;  %600 = vmatpush.msra.mxu3 %v2549_v6 }
  0x50   : > { %389 = vmatpush.msra.mxu0 %v2573_v37  ;;  %478 = vmatpush.msra.mxu1 %v477_v12  ;;  %v330_v12 = vld [vmem:[%s2404_s22 + $0xf8] sm:$0xff]  ;;  %v2704_v19 = vand.u32 4294901760, %v2680_v55 }
  0x51   : > { %556 = vmatpush.msra.mxu2 %v2580_v39  ;;  %602 = vmatpush.msra.mxu3 %v2573_v37  ;;  %v2674_v1 = vand.u32 4294901760, %v330_v12 }
  0x52   : > { %619 = vmatpush.msrb.mxu0 %v409_v22  ;;  %484 = vmatpush.msra.mxu1 %v483_v53  ;;  %v501_v22 = vand.u32 4294901760, %v500_v63  ;;  %v3215_v53 = vand.u32 4294901760, %v2654_v2  ;;  %v751_v25 = vsub.f32 %v2680_v55, %v2704_v19 }
  0x53   : > { %559 = vmatpush.msra.mxu2 %v2600_v54  ;;  %606 = vmatmul.f32.vlgmr.msra.gmra.mxu3 %v2615_v7 }
  0x54   : > { %623 = vmatpush.msrb.mxu0 %v415_v23  ;;  %562 = vmatmul.f32.vlgmr.msra.gmra.mxu2 %v2588_v49  ;;  %v401_v23 = vsub.f32 %v2641_v31, %v2666_v44  ;;  %v788_v16 = vsub.f32 %v2654_v2, %v3215_v53 }
  0x55   : > { %490 = vmatpush.msra.mxu1 %v489_v60  ;;  %395 = vmatmul.f32.vlgmr.msra.gmra.mxu0 %v2663_v41  ;;  %v2686_v60 = vand.u32 4294901760, %v328_v14 }
  0x56   : > { %627 = vmatpush.msrb.mxu0 %v421_v24  ;;  %745 = vmatpush.msrb.mxu2 %v2575_v38  ;;  %v2695_v24 = vsub.f32 %v330_v12, %v2674_v1  ;;  %v338_v12 = vld [vmem:[%s3194_s1 + $0x18] sm:$0xff] }
  0x57   : > { %496 = vmatpush.msra.mxu1 %v495_v32  ;;  %784 = vmatpush.msrb.mxu3 %v783_v62  ;;  %v2711_v63 = vsub.f32 %v328_v14, %v2686_v60  ;;  %v2727_v14 = vsub.f32 %v326_v15, %v2697_v18  ;;  %v318_v15 = vld [vmem:[%s2404_s22 + $0x98] sm:$0xff] }
  0x58   : > { %631 = vmatpush.msrb.mxu0 %v427_v27  ;;  %v2707_v27 = vand.u32 4294901760, %v401_v23  ;;  %747 = vmatpush.msrb.mxu2 %v2629_v43  ;;  %v3213_v32 = vand.u32 4294901760, %v2695_v24  ;;  %v2750_v23 = vsub.f32 %v324_v50, %v2720_v20  ;;  %v2763_v50 = vand.u32 4294901760, %v751_v25 }
  0x59   : > { %502 = vmatpush.msra.mxu1 %v501_v22  ;;  %v356_v22 = vsel %vm351_vm0, %v338_v12, 0  ;;  %2176 = vset.pattern.permute.xlu0 %v3210_v28  ;;  %v3214_v34 = vand.u32 4294901760, %v2727_v14  ;;  %v3228_v25 = vand.u32 4294901760, %v2516_v52 }
  0x5a   : > { %504 = vmatmul.f32.vlgmr.msra.gmra.mxu1 %v2561_v26  ;;  %635 = vmatpush.msrb.mxu0 %v433_v33  ;;  %v789_v33 = vand.u32 4294901760, %v788_v16  ;;  %v316_v16 = vld [vmem:[%s2404_s22 + $0x88] sm:$0xff]  ;;  %3227 = vst [vmem:[#allocation11_spill] sm:$0xff] %v2763_v50 }
  0x5b   : > { %690 = vmatpush.msrb.mxu1 %v2413_v3  ;;  %816 = vmatpush.msra.mxu2 %v2604_v59  ;;  %v320_v3 = vld [vmem:[%s2404_s22 + $0xa8] sm:$0xff] }
  0x5c   : > { %639 = vmatpush.msrb.mxu0 %v439_v40  ;;  %567 = vmatmul.f32.gmra.mxu2 %v2641_v31  ;;  %v2734_v40 = vand.u32 4294901760, %v322_v51  ;;  %v2740_v62 = vand.u32 4294901760, %v320_v3 }
  0x5d   : > { %692 = vmatpush.msrb.mxu1 %v2415_v4  ;;  %612 = vmatmul.f32.gmra.mxu3 %v2666_v44  ;;  %v3212_v4 = vand.u32 4294901760, %v2711_v63  ;;  %v304_v44 = vld [vmem:[%s2404_s22 + $0x28] sm:$0xff] }
  0x5e   : > { %643 = vmatpush.msrb.mxu0 %v445_v42  ;;  %v339_v42 = vld [vmem:[%s3195_s2] sm:$0xff]  ;;  %790 = vmatpush.msrb.mxu3 %v789_v33  ;;  %v2766_v12 = vsub.f32 %v322_v51, %v2734_v40  ;;  %v2775_v28 = vsub.f32 %v320_v3, %v2740_v62  ;;  %v2781_v51 = vand.u32 4294901760, %v316_v16  ;;  %v984_v3 = vsub.f32 %v2727_v14, %v3214_v34 }
  0x5f   : > { %694 = vmatpush.msrb.mxu1 %v2417_v5  ;;  %403 = vmatmul.f32.gmra.mxu0 %v2707_v27  ;;  %v972_v5 = vsub.f32 %v2695_v24, %v3213_v32  ;;  %v978_v33 = vsub.f32 %v2711_v63, %v3212_v4  ;;  %v312_v4 = vld [vmem:[%s2404_s22 + $0x68] sm:$0xff] }
  0x60   : > { %647 = vmatpush.msrb.mxu0 %v451_v48  ;;  %v2757_v48 = vand.u32 4294901760, %v356_v22  ;;  %343 = vperm.xlu0 %2176, %v339_v42   ;;  %v3217_v32 = vand.u32 4294901760, %v2766_v12  ;;  %v2813_v53 = vand.u32 4294901760, %v312_v4 }
  0x61   : > { %696 = vmatpush.msrb.mxu1 %v2422_v9  ;;  %v2768_v9 = vand.u32 4294901760, %v318_v15  ;;  %819 = vmatpush.msra.mxu2 %v2654_v2 }
  0x62   : > { %508 = vmatmul.f32.gmra.mxu1 %v2617_v8  ;;  %651 = vmatpush.msrb.mxu0 %v457_v58  ;;  %v3216_v58 = vand.u32 4294901760, %v2750_v23  ;;  %v2790_v42 = vsub.f32 %v356_v22, %v2757_v48  ;;  %v979_v22 = vand.u32 4294901760, %v978_v33 }
  0x63   : > { %698 = vmatpush.msrb.mxu1 %v2424_v10  ;;  %846 = vmatpush.msra.mxu3 %v2575_v38  ;;  %v973_v10 = vand.u32 4294901760, %v972_v5  ;;  %v2797_v52 = vsub.f32 %v318_v15, %v2768_v9  ;;  %v3229_v5 = vand.u32 4294901760, %v2526_v56  ;;  %v2811_v15 = vsub.f32 %v316_v16, %v2781_v51 }
  0x64   : > { %655 = vmatpush.msrb.mxu0 %v3228_v25  ;;  %753 = vmatmul.f32.vlgmr.msrb.gmra.mxu2 %v2763_v50  ;;  %v990_v34 = vsub.f32 %v2750_v23, %v3216_v58  ;;  %v985_v56 = vand.u32 4294901760, %v984_v3  ;;  %v2817_v33 = vand.u32 4294901760, %v2790_v42  ;;  %v996_v16 = vsub.f32 %v2766_v12, %v3217_v32  ;;  %v308_v3 = vld [vmem:[%s2404_s22 + $0x48] sm:$0xff]  ;;  %v306_v50 = vld [vmem:[%s2404_s22 + $0x38] sm:$0xff] }
  0x65   : > { %700 = vmatpush.msrb.mxu1 %v2426_v11  ;;  %848 = vmatpush.msra.mxu3 %v2629_v43  ;;  %v2799_v11 = vand.u32 4294901760, %v314_v45 }
  0x66   : > { %921 = vmatpush.msrb.mxu2 %v2674_v1  ;;  %659 = vmatpush.msrb.mxu0 %v3229_v5  ;;  %v3230_v5 = vand.u32 4294901760, %v2538_v61  ;;  %v340_v61 = vld [vmem:[%s3195_s2 + $0x8] sm:$0xff]  ;;  %v991_v32 = vand.u32 4294901760, %v990_v34  ;;  %v3234_v34 = vand.u32 4294901760, %v2797_v52 }
  0x67   : > { %702 = vmatpush.msrb.mxu1 %v2441_v17  ;;  %792 = vmatmul.f32.vlgmr.msrb.gmra.mxu3 %v2659_v30  ;;  %v310_v17 = vld [vmem:[%s2404_s22 + $0x58] sm:$0xff]  ;;  %v2828_v25 = vsub.f32 %v314_v45, %v2799_v11  ;;  %v2871_v45 = vand.u32 4294901760, %v306_v50 }
  0x68   : > { %923 = vmatpush.msrb.mxu2 %v2686_v60  ;;  %974 = vmatpush.msrb.mxu3 %v973_v10  ;;  %v3231_v10 = vand.u32 4294901760, %v2775_v28  ;;  %v2842_v58 = vand.u32 4294901760, %v310_v17 }
  0x69   : > { %663 = vmatpush.msrb.mxu0 %v3230_v5  ;;  %704 = vmatpush.msrb.mxu1 %v2450_v21  ;;  %v3232_v5 = vand.u32 4294901760, %v2558_v13  ;;  %v3233_v13 = vand.u32 4294901760, %v2571_v36  ;;  %v3235_v36 = vand.u32 4294901760, %v2580_v39  ;;  %v3237_v39 = vand.u32 4294901760, %v2600_v54 }
  0x6a   : > { %925 = vmatpush.msrb.mxu2 %v2697_v18  ;;  %980 = vmatpush.msrb.mxu3 %v979_v22  ;;  %v1002_v21 = vsub.f32 %v2775_v28, %v3231_v10  ;;  %v2845_v22 = vsub.f32 %v312_v4, %v2813_v53  ;;  %v759_v10 = vsub.f32 %v2790_v42, %v2817_v33  ;;  %v2857_v4 = vand.u32 4294901760, %v308_v3 }
  0x6b   : > { %667 = vmatpush.msrb.mxu0 %v3232_v5  ;;  %706 = vmatpush.msrb.mxu1 %v2466_v29  ;;  %v997_v29 = vand.u32 4294901760, %v996_v16  ;;  %v1008_v5 = vsub.f32 %v2797_v52, %v3234_v34  ;;  %v3236_v16 = vand.u32 4294901760, %v2811_v15  ;;  %v2869_v34 = vsub.f32 %v310_v17, %v2842_v58 }
  0x6c   : > { %927 = vmatpush.msrb.mxu2 %v2720_v20  ;;  %986 = vmatpush.msrb.mxu3 %v985_v56  ;;  %v1003_v56 = vand.u32 4294901760, %v1002_v21  ;;  %v3238_v21 = vand.u32 4294901760, %v2828_v25  ;;  %v2883_v17 = vsub.f32 %v308_v3, %v2857_v4  ;;  %v2896_v3 = vsub.f32 %v306_v50, %v2871_v45 }
  0x6d   : > { %348 = vperm.xlu0 %2176, %v340_v61   ;;  %671 = vmatpush.msrb.mxu0 %v3233_v13  ;;  %v1014_v61 = vsub.f32 %v2811_v15, %v3236_v16  ;;  %v1025_v13 = vand.u32 4294901760, %v2845_v22  ;;  %v2885_v16 = vand.u32 4294901760, %v304_v44 }
  0x6e   : > { %708 = vmatpush.msrb.mxu1 %v2484_v35  ;;  %929 = vmatpush.msrb.mxu2 %v2734_v40  ;;  %v2875_v35 = vand.u32 4294901760, %v759_v10 }
  0x6f   : > { %992 = vmatpush.msrb.mxu3 %v991_v32  ;;  %675 = vmatpush.msrb.mxu0 %v3235_v36  ;;  %v1009_v32 = vand.u32 4294901760, %v1008_v5  ;;  %v1020_v36 = vsub.f32 %v2828_v25, %v3238_v21  ;;  %v1015_v54 = vand.u32 4294901760, %v1014_v61  ;;  %v1026_v10 = vsub.f32 %v2845_v22, %v1025_v13  ;;  %v300_v5 = vld [vmem:[%s2404_s22 + $0x8] sm:$0xff] }
  0x70   : > { %710 = vmatpush.msrb.mxu1 %v2503_v46  ;;  %931 = vmatpush.msrb.mxu2 %v2740_v62  ;;  %v302_v46 = vld [vmem:[%s2404_s22 + $0x18] sm:$0xff]  ;;  %v1037_v61 = vand.u32 4294901760, %v2883_v17  ;;  %v2915_v21 = vand.u32 4294901760, %v300_v5 }
  0x71   : > { %998 = vmatpush.msrb.mxu3 %v997_v29  ;;  %679 = vmatpush.msrb.mxu0 %v3237_v39  ;;  %v1031_v29 = vand.u32 4294901760, %v2869_v34  ;;  %v2906_v39 = vsub.f32 %v304_v44, %v2885_v16  ;;  %v3239_v44 = vand.u32 4294901760, %v2604_v59 }
  0x72   : > { %712 = vmatpush.msrb.mxu1 %v2507_v47  ;;  %933 = vmatpush.msrb.mxu2 %v2768_v9  ;;  %v2900_v47 = vand.u32 4294901760, %v302_v46 }
  0x73   : > { %1004 = vmatpush.msrb.mxu3 %v1003_v56  ;;  %681 = vmatmul.f32.vlgmr.msrb.gmra.mxu0 %v2561_v26  ;;  %v1021_v56 = vand.u32 4294901760, %v1020_v36  ;;  %v1032_v50 = vsub.f32 %v2869_v34, %v1031_v29 }
  0x74   : > { %761 = vmatmul.f32.gmra.mxu2 %v2875_v35  ;;  %714 = vmatpush.msrb.mxu1 %v2528_v57  ;;  %v1027_v57 = vand.u32 4294901760, %v1026_v10  ;;  %v2921_v36 = vsub.f32 %v302_v46, %v2900_v47  ;;  %v3240_v10 = vand.u32 4294901760, %v2654_v2  ;;  %v2936_v46 = vsub.f32 %v300_v5, %v2915_v21 }
  0x75   : > { %935 = vmatpush.msrb.mxu2 %v2781_v51  ;;  %1010 = vmatpush.msrb.mxu3 %v1009_v32  ;;  %v1043_v32 = vand.u32 4294901760, %v2896_v3 }
  0x76   : > { %796 = vmatmul.f32.gmra.mxu3 %v2757_v48  ;;  %716 = vmatpush.msrb.mxu1 %v2544_v0  ;;  %v1038_v0 = vsub.f32 %v2883_v17, %v1037_v61 }
  0x77   : > { %937 = vmatpush.msrb.mxu2 %v2799_v11  ;;  %1016 = vmatpush.msrb.mxu3 %v1015_v54  ;;  %v1049_v54 = vand.u32 4294901760, %v2906_v39  ;;  %v1044_v59 = vsub.f32 %v2896_v3, %v1043_v32 }
  0x78   : > { %718 = vmatpush.msrb.mxu1 %v2549_v6  ;;  %879 = vmatpush.msra.mxu0 %v3239_v44  ;;  %v1033_v6 = vand.u32 4294901760, %v1032_v50  ;;  %v1039_v2 = vand.u32 4294901760, %v1038_v0 }
  0x79   : > { %939 = vmatpush.msrb.mxu2 %v2813_v53  ;;  %1022 = vmatpush.msrb.mxu3 %v1021_v56  ;;  %v1050_v56 = vsub.f32 %v2906_v39, %v1049_v54  ;;  %v1045_v5 = vand.u32 4294901760, %v1044_v59  ;;  %v3243_v59 = vand.u32 4294901760, %v2727_v14 }
  0x7a   : > { %720 = vmatpush.msrb.mxu1 %v2573_v37  ;;  %883 = vmatpush.msra.mxu0 %v3240_v10  ;;  %v1055_v37 = vand.u32 4294901760, %v2921_v36  ;;  %v3241_v10 = vand.u32 4294901760, %v2695_v24 }
  0x7b   : > { %941 = vmatpush.msrb.mxu2 %v2842_v58  ;;  %1028 = vmatpush.msrb.mxu3 %v1027_v57  ;;  %v1061_v57 = vand.u32 4294901760, %v2936_v46  ;;  %v1051_v50 = vand.u32 4294901760, %v1050_v56 }
  0x7c   : > { %685 = vmatmul.f32.gmra.mxu0 %v2617_v8  ;;  %722 = vmatmul.f32.vlgmr.msrb.gmra.mxu1 %v2561_v26 }
  0x7d   : > { %822 = vmatmul.f32.vlgmr.msra.gmra.mxu2 %v2680_v55  ;;  %908 = vmatpush.msra.mxu1 %v2575_v38  ;;  %v1056_v38 = vsub.f32 %v2921_v36, %v1055_v37 }
  0x7e   : > { %1076 = vmatpush.msrb.mxu0 %v2695_v24  ;;  %943 = vmatpush.msrb.mxu2 %v2857_v4  ;;  %v3244_v24 = vand.u32 4294901760, %v2750_v23 }
  0x7f   : > { %1034 = vmatpush.msrb.mxu3 %v1033_v6  ;;  %910 = vmatpush.msra.mxu1 %v2629_v43  ;;  %v1062_v43 = vsub.f32 %v2936_v46, %v1061_v57  ;;  %v1057_v44 = vand.u32 4294901760, %v1056_v38  ;;  %v3242_v6 = vand.u32 4294901760, %v2711_v63 }
  0x80   : > { %852 = vmatmul.f32.vlgmr.msra.gmra.mxu3 %v2704_v19  ;;  %1079 = vmatpush.msrb.mxu0 %v2711_v63  ;;  %v3245_v63 = vand.u32 4294901760, %v2766_v12 }
  0x81   : > { %945 = vmatpush.msrb.mxu2 %v2871_v45  ;;  %1040 = vmatpush.msrb.mxu3 %v1039_v2  ;;  %v1063_v0 = vand.u32 4294901760, %v1062_v43 }
  0x82   : > { %1134 = vmatpush.msrb.mxu1 %v2674_v1  ;;  %1082 = vmatpush.msrb.mxu0 %v2727_v14 }
  0x83   : > { %947 = vmatpush.msrb.mxu2 %v2885_v16  ;;  %1046 = vmatpush.msrb.mxu3 %v1045_v5 }
  0x84   : > { %1136 = vmatpush.msrb.mxu1 %v2686_v60  ;;  %1085 = vmatpush.msrb.mxu0 %v2750_v23  ;;  %v3247_v23 = vand.u32 4294901760, %v2797_v52 }
  0x85   : > { %949 = vmatpush.msrb.mxu2 %v2900_v47  ;;  %1052 = vmatpush.msrb.mxu3 %v1051_v50 }
  0x86   : > { %1138 = vmatpush.msrb.mxu1 %v2697_v18  ;;  %827 = vmatmul.f32.gmra.mxu2 %v2790_v42 }
  0x87   : > { %726 = vmatmul.f32.gmra.mxu1 %v2617_v8  ;;  %1088 = vmatpush.msrb.mxu0 %v2766_v12 }
  0x88   : > { %951 = vmatpush.msrb.mxu2 %v2915_v21  ;;  %1058 = vmatpush.msrb.mxu3 %v1057_v44 }
  0x89   : > { %1140 = vmatpush.msrb.mxu1 %v2720_v20  ;;  %858 = vmatmul.f32.gmra.mxu3 %v2817_v33 }
  0x8a   : > { %885 = vmatmul.f32.vlgmr.msra.gmra.mxu0 %v2659_v30  ;;  %1181 = vmatpush.msra.mxu2 %v3241_v10 }
  0x8b   : > { %1091 = vmatpush.msrb.mxu0 %v2775_v28  ;;  %1064 = vmatpush.msrb.mxu3 %v1063_v0 }
  0x8c   : > { %1142 = vmatpush.msrb.mxu1 %v2734_v40  ;;  %1185 = vmatpush.msra.mxu2 %v3242_v6 }
  0x8d   : > { %1094 = vmatpush.msrb.mxu0 %v2797_v52  ;;  %1252 = vmatpush.msra.mxu3 %v2674_v1  ;;  %v334_v1 = vld [vmem:[%s2404_s22 + $0x118] sm:$0xff] }
  0x8e   : > { %1144 = vmatpush.msrb.mxu1 %v2740_v62  ;;  %1189 = vmatpush.msra.mxu2 %v3243_v59  ;;  %v3002_v14 = vand.u32 4294901760, %v334_v1 }
  0x8f   : > { %1097 = vmatpush.msrb.mxu0 %v2811_v15  ;;  %1254 = vmatpush.msra.mxu3 %v2686_v60  ;;  %v3246_v60 = vand.u32 4294901760, %v2775_v28 }
  0x90   : > { %1146 = vmatpush.msrb.mxu1 %v2768_v9  ;;  %1193 = vmatpush.msra.mxu2 %v3244_v24  ;;  %v1342_v12 = vsub.f32 %v334_v1, %v3002_v14 }
  0x91   : > { %912 = vmatmul.f32.vlgmr.msra.gmra.mxu1 %v2659_v30  ;;  %1100 = vmatpush.msrb.mxu0 %v2828_v25 }
  0x92   : > { %1256 = vmatpush.msra.mxu3 %v2697_v18  ;;  %1148 = vmatpush.msrb.mxu1 %v2781_v51  ;;  %v332_v18 = vld [vmem:[%s2404_s22 + $0x108] sm:$0xff]  ;;  %s2227_s22 = sshra.s32 %s2038_s26, 4  ;;  %s2228_s22 = int_to_ptr.hbm [resolvable:$true] %s2227_s22 }
  0x93   : > { %889 = vmatmul.f32.gmra.mxu0 %v2757_v48  ;;  %1197 = vmatpush.msra.mxu2 %v3245_v63  ;;  %v3015_v28 = vand.u32 4294901760, %v332_v18  ;;  %s2229_s11 = scalar_lea.hbm %s2228_s22, 16  ;;  %p2234_p3 = scmp.lt.s32.totalorder %s2228_s22, %s3200_s7 }
  0x94   : > { %1103 = vmatpush.msrb.mxu0 %v2845_v22  ;;  %1258 = vmatpush.msra.mxu3 %v2720_v20  ;;  %v3248_v20 = vand.u32 4294901760, %v2811_v15  ;;  %p2230_p6 = scmp.ne.s32.totalorder %s2228_s22, %s2229_s11  ;;  %p2235_p4 = scmp.lt.s32.totalorder %s2233_s23, %s2229_s11 }
  0x95   : > { %1150 = vmatpush.msrb.mxu1 %v2799_v11  ;;  %1201 = vmatpush.msra.mxu2 %v3246_v60  ;;  %v1348_v52 = vsub.f32 %v332_v18, %v3015_v28 }
  0x96   : > { %1106 = vmatpush.msrb.mxu0 %v2869_v34  ;;  %1260 = vmatpush.msra.mxu3 %v2734_v40  ;;  %v3249_v40 = vand.u32 4294901760, %v2828_v25  ;;  %p2231_p13 = pnand %p2230_p6, %p2370_p11  ;;  %p2236_p5 = por %p2235_p4, %p2234_p3 }
  0x97   : > { %1152 = vmatpush.msrb.mxu1 %v2813_v53  ;;  %1205 = vmatpush.msra.mxu2 %v3247_v23 }
  0x98   : > { %1109 = vmatpush.msrb.mxu0 %v2883_v17  ;;  %1262 = vmatpush.msra.mxu3 %v2740_v62  ;;  %v1343_v62 = vand.u32 4294901760, %v1342_v12  ;;  %p2232_p2 = pneg %p2231_p13 }
  0x99   : > { %1154 = vmatpush.msrb.mxu1 %v2842_v58  ;;  %1209 = vmatpush.msra.mxu2 %v3248_v20 }
  0x9a   : > { %916 = vmatmul.f32.gmra.mxu1 %v2757_v48  ;;  %1112 = vmatpush.msrb.mxu0 %v2896_v3  ;;  %p2237_p7 = pnand %p2236_p5, %p2232_p2 }
  0x9b   : > { %1264 = vmatpush.msra.mxu3 %v2768_v9  ;;  %957 = vmatmul.f32.vlgmr.msrb.gmra.mxu2 %v2663_v41  ;;  %v1344_v41 = vsub.f32 %v1342_v12, %v1343_v62  ;;  %v1349_v9 = vand.u32 4294901760, %v1348_v52 }
  0x9c   : > { %1156 = vmatpush.msrb.mxu1 %v2857_v4  ;;  %1115 = vmatpush.msrb.mxu0 %v2906_v39 }
  0x9d   : > { %1213 = vmatpush.msra.mxu2 %v3249_v40  ;;  %1266 = vmatpush.msra.mxu3 %v2781_v51  ;;  %v1345_v51 = vand.u32 4294901760, %v1344_v41 }
  0x9e   : > { %1066 = vmatmul.f32.vlgmr.msrb.gmra.mxu3 %v2561_v26  ;;  %1158 = vmatpush.msrb.mxu1 %v2871_v45 }
  0x9f   : > { %1118 = vmatpush.msrb.mxu0 %v2921_v36  ;;  %1217 = vmatpush.msra.mxu2 %v1025_v13 }
  0xa0   : > { %1268 = vmatpush.msra.mxu3 %v2799_v11  ;;  %1160 = vmatpush.msrb.mxu1 %v2885_v16  ;;  %v1350_v11 = vsub.f32 %v1348_v52, %v1349_v9 }
  0xa1   : > { %1121 = vmatpush.msrb.mxu0 %v2936_v46  ;;  %1221 = vmatpush.msra.mxu2 %v1031_v29 }
  0xa2   : > { %1270 = vmatpush.msra.mxu3 %v2813_v53  ;;  %1124 = vmatmul.f32.vlgmr.msrb.gmra.mxu0 %v2588_v49  ;;  %v1351_v49 = vand.u32 4294901760, %v1350_v11 }
  0xa3   : > { %1162 = vmatpush.msrb.mxu1 %v2900_v47  ;;  %1225 = vmatpush.msra.mxu2 %v1037_v61 }
  0xa4   : > { %1272 = vmatpush.msra.mxu3 %v2842_v58  ;;  %965 = vmatmul.f32.gmra.mxu2 %v2707_v27 }
  0xa5   : > { %1164 = vmatpush.msrb.mxu1 %v2915_v21  ;;  %1229 = vmatpush.msra.mxu2 %v1043_v32 }
  0xa6   : > { %1168 = vmatmul.f32.vlgmr.msrb.gmra.mxu1 %v2615_v7  ;;  %1274 = vmatpush.msra.mxu3 %v2857_v4  ;;  %v3250_v7 = vld [vmem:[#allocation10_spill] sm:$0xff] }
  0xa7   : > { %1070 = vmatmul.f32.gmra.mxu3 %v2617_v8  ;;  %1233 = vmatpush.msra.mxu2 %v1049_v54 }
  0xa8   : > { %1276 = vmatpush.msra.mxu3 %v2871_v45  ;;  %1307 = vmatpush.msra.mxu0 %v3002_v14 }
  0xa9   : > { %1237 = vmatpush.msra.mxu2 %v1055_v37  ;;  %1346 = vmatpush.msra.mxu1 %v1345_v51 }
  0xaa   : > { %1278 = vmatpush.msra.mxu3 %v2885_v16  ;;  %1129 = vmatmul.f32.gmra.mxu0 %v2641_v31  ;;  %v3251_v31 = vld [vmem:[#allocation11_spill] sm:$0xff] }
  0xab   : > { %1241 = vmatpush.msra.mxu2 %v1061_v57  ;;  %1309 = vmatpush.msra.mxu0 %v3015_v28 }
  0xac   : > { %1280 = vmatpush.msra.mxu3 %v2900_v47  ;;  %1243 = vmatmul.f32.vlgmr.msra.gmra.mxu2 %v2561_v26 }
  0xad   : > { %1352 = vmatpush.msra.mxu1 %v1351_v49  ;;  %1378 = vmatpush.msrb.mxu0 %v1342_v12 }
  0xae   : > { %1174 = vmatmul.f32.gmra.mxu1 %v3250_v7  ;;  %1282 = vmatpush.msra.mxu3 %v2915_v21 }
  0xaf   : > { %1284 = vmatmul.f32.vlgmr.msra.gmra.mxu3 %v2561_v26  ;;  %2120 = vmatpush.msrb.mxu2 %v3002_v14  ;;  %v3252_v26 = vmov 0  }
  0xb0   : > { %1381 = vmatpush.msrb.mxu0 %v1348_v52  ;;  %1408 = vmatpush.msrb.mxu1 %v3002_v14 }
  0xb1   : > { %2121 = vmatpush.msrb.mxu2 %v3015_v28  ;;  %2122 = vmatpush.msrb.mxu3 %v1345_v51 }
  0xb2   : > { %1315 = vmatmul.f32.vlgmr.msra.gmra.mxu0 %v3251_v31  ;;  %1410 = vmatpush.msrb.mxu1 %v3015_v28 }
  0xb3   : > { %2123 = vmatpush.msrb.mxu3 %v1351_v49  ;;  %1441 = vmatpush.msra.mxu2 %v1343_v62 }
  0xb4   : > { %1247 = vmatmul.f32.gmra.mxu2 %v2617_v8  ;;  %2177 = vset.pattern.permute.xlu1 %v3252_v26 }
  0xb5   : > { %1470 = vmatpush.msra.mxu3 %v3002_v14  ;;  %1445 = vmatpush.msra.mxu2 %v1349_v9 }
  0xb6   : > { %1354 = vmatmul.f32.vlgmr.msra.gmra.mxu1 %v2659_v30  ;;  %2178 = vset.pattern.permute.xlu2 %v3252_v26 }
  0xb7   : > { %1472 = vmatpush.msra.mxu3 %v3015_v28 }
  0xb8   : > { %1288 = vmatmul.f32.gmra.mxu3 %v2617_v8 }
  0xba   : > { %1384 = vmatmul.f32.vlgmr.msrb.gmra.mxu0 %v2680_v55 }
  0xbc   : > { %1323 = vmatmul.f32.vlgmr.msrb.gmra.mxu2 %v2875_v35 }
  0xbe   : > { %1414 = vmatmul.f32.vlgmr.msrb.gmra.mxu1 %v2704_v19 }
  0xc0   : > { %1358 = vmatmul.f32.vlgmr.msrb.gmra.mxu3 %v2757_v48 }
  0xc2   : > { %1389 = vmatmul.f32.gmra.mxu0 %v2790_v42 }
  0xc4   : > { %1447 = vmatmul.f32.vlgmr.msra.gmra.mxu2 %v2659_v30 }
  0xc6   : > { %1420 = vmatmul.f32.gmra.mxu1 %v2817_v33 }
  0xc8   : > { %1474 = vmatmul.f32.vlgmr.msra.gmra.mxu3 %v2659_v30 }
  0xcc   : > { %1451 = vmatmul.f32.gmra.mxu2 %v2757_v48 }
  0xd0   : > { %1478 = vmatmul.f32.gmra.mxu3 %v2757_v48 }
  0xd2   : > { %v396_v8 = vpop.f32.mrf.mxu0  ;;  %v344_v53 = vpop.permute.xlu0 %343 }
  0xd3   : > { %v397_v55 = vadd.f32 %v396_v8, %v344_v53 }
  0xd6   : > { %v607_v15 = vpop.f32.mrf.mxu3 }
  0xd7   : > { %v505_v27 = vpop.f32.mrf.mxu1  ;;  %v563_v19 = vpop.f32.mrf.mxu2 }
  0xd8   : > { %v506_v58 = vadd.f32 %v505_v27, %v397_v55 }
  0xda   : > { %v564_v25 = vadd.f32 %v563_v19, %v506_v58 }
  0xdc   : > { %v608_v45 = vadd.f32 %v607_v15, %v564_v25  ;;  %v404_v42 = vpop.f32.mrf.mxu0 }
  0xdf   : > { %v349_v22 = vpop.permute.xlu0 %348  ;;  %v509_v4 = vpop.f32.mrf.mxu1 }
  0xe0   : > { %v405_v13 = vadd.f32 %v404_v42, %v349_v22  ;;  %v568_v34 = vpop.f32.mrf.mxu2  ;;  %v613_v35 = vpop.f32.mrf.mxu3 }
  0xe2   : > { %v510_v33 = vadd.f32 %v509_v4, %v405_v13 }
  0xe4   : > { %v569_v30 = vadd.f32 %v568_v34, %v510_v33 }
  0xe6   : > { %v614_v17 = vadd.f32 %v613_v35, %v569_v30 }
  0xe8   : > { %v754_v3 = vpop.f32.mrf.mxu2 }
  0xea   : > { %v793_v39 = vpop.f32.mrf.mxu3 }
  0xf0   : > { %v682_v16 = vpop.f32.mrf.mxu0 }
  0xf1   : > { %v683_v48 = vadd.f32 %v682_v16, %v608_v45 }
  0xf7   : > { %v762_v36 = vpop.f32.mrf.mxu2 }
  0xf9   : > { %v723_v29 = vpop.f32.mrf.mxu1  ;;  %v686_v21 = vpop.f32.mrf.mxu0 }
  0xfa   : > { %v724_v47 = vadd.f32 %v723_v29, %v683_v48  ;;  %v687_v54 = vadd.f32 %v686_v21, %v614_v17  ;;  %v797_v37 = vpop.f32.mrf.mxu3 }
  0xfc   : > { %v755_v61 = vadd.f32 %v754_v3, %v724_v47 }
  0xfe   : > { %v794_v32 = vadd.f32 %v793_v39, %v755_v61 }
 0x100   : > { %v823_v57 = vpop.f32.mrf.mxu2 }
 0x101   : > { %v824_v33 = vadd.f32 %v823_v57, %v794_v32 }
 0x103   : > { %v853_v38 = vpop.f32.mrf.mxu3 }
 0x104   : > { %v727_v46 = vpop.f32.mrf.mxu1  ;;  %v854_v29 = vadd.f32 %v853_v38, %v824_v33 }
 0x105   : > { %v728_v2 = vadd.f32 %v727_v46, %v687_v54 }
 0x107   : > { %v763_v56 = vadd.f32 %v762_v36, %v728_v2  ;;  %v886_v50 = vpop.f32.mrf.mxu0 }
 0x108   : > { %v887_v36 = vadd.f32 %v886_v50, %v854_v29 }
 0x109   : > { %v798_v5 = vadd.f32 %v797_v37, %v763_v56  ;;  %v828_v44 = vpop.f32.mrf.mxu2 }
 0x10b   : > { %v829_v4 = vadd.f32 %v828_v44, %v798_v5 }
 0x10c   : > { %v859_v0 = vpop.f32.mrf.mxu3 }
 0x10d   : > { %v860_v17 = vadd.f32 %v859_v0, %v829_v4 }
 0x10e   : > { %v913_v43 = vpop.f32.mrf.mxu1 }
 0x10f   : > { %v3091_v2 = vadd.f32 %v913_v43, %v887_v36 }
 0x110   : > { %v890_v10 = vpop.f32.mrf.mxu0 }
 0x111   : > { %v891_v61 = vadd.f32 %v890_v10, %v860_v17  ;;  %v1482_v38 = vmax.f32 %v3091_v2, 0.0 }
 0x117   : > { %v917_v6 = vpop.f32.mrf.mxu1 }
 0x118   : > { %v3089_v54 = vadd.f32 %v917_v6, %v891_v61  ;;  %v1492_v6 = vld [vmem:[%s3196_s3] sm:$0xff] }
 0x11a   : > { %v1484_v5 = vmax.f32 %v3089_v54, 0.0 }
 0x11c   : > { %v1486_v50 = vadd.f32 %v1484_v5, %v1482_v38 }
 0x11e   : > { %v958_v59 = vpop.f32.mrf.mxu2 }
 0x11f   : > { %v1125_v24 = vpop.f32.mrf.mxu0  ;;  %v959_v14 = vadd.f32 %v958_v59, %v344_v53  ;;  %v1502_v59 = vsel %vm1500_vm1, %v1492_v6, 0 }
 0x121   : > { %v1067_v1 = vpop.f32.mrf.mxu3 }
 0x122   : > { %v1068_v20 = vadd.f32 %v1067_v1, %v959_v14  ;;  %v1493_v1 = vld [vmem:[%s3196_s3 + $0x8] sm:$0xff] }
 0x123   : > { %v1169_v63 = vpop.f32.mrf.mxu1 }
 0x124   : > { %v1126_v62 = vadd.f32 %v1125_v24, %v1068_v20  ;;  %v1530_v24 = vand.u32 4294901760, %v1502_v59 }
 0x126   : > { %v1170_v9 = vadd.f32 %v1169_v63, %v1126_v62  ;;  %v1531_v63 = vsub.f32 %v1502_v59, %v1530_v24 }
 0x127   : > { %v966_v60 = vpop.f32.mrf.mxu2  ;;  %v1130_v23 = vpop.f32.mrf.mxu0 }
 0x128   : > { %v967_v28 = vadd.f32 %v966_v60, %v349_v22  ;;  %v1505_v60 = vsel %vm1500_vm1, %v1493_v1, 0  ;;  %v1532_v14 = vand.u32 4294901760, %v1531_v63  ;;  %v1499_v1 = vld [vmem:[%s3197_s4 + $0x18] sm:$0xff] }
 0x12a   : > { %v1071_v18 = vpop.f32.mrf.mxu3  ;;  %v1533_v20 = vsub.f32 %v1531_v63, %v1532_v14 }
 0x12b   : > { %v1175_v12 = vpop.f32.mrf.mxu1  ;;  %v1072_v52 = vadd.f32 %v1071_v18, %v967_v28  ;;  %v1538_v18 = vand.u32 4294901760, %v1505_v60 }
 0x12d   : > { %v1131_v11 = vadd.f32 %v1130_v23, %v1072_v52  ;;  %v1494_v23 = vld [vmem:[%s3196_s3 + $0x10] sm:$0xff]  ;;  %v1539_v28 = vsub.f32 %v1505_v60, %v1538_v18  ;;  %v1534_v52 = vand.u32 4294901760, %v1533_v20 }
 0x12f   : > { %v1244_v40 = vpop.f32.mrf.mxu2  ;;  %v1316_v51 = vpop.f32.mrf.mxu0  ;;  %v1176_v26 = vadd.f32 %v1175_v12, %v1131_v11  ;;  %v1508_v12 = vsel %vm1500_vm1, %v1494_v23, 0  ;;  %v1495_v11 = vld [vmem:[%s3196_s3 + $0x18] sm:$0xff] }
 0x130   : > { %v1245_v49 = vadd.f32 %v1244_v40, %v1170_v9  ;;  %v1546_v9 = vand.u32 4294901760, %v1508_v12 }
 0x132   : > { %v1285_v41 = vpop.f32.mrf.mxu3 }
 0x133   : > { %v1355_v31 = vpop.f32.mrf.mxu1  ;;  %v1286_v55 = vadd.f32 %v1285_v41, %v1245_v49  ;;  %v1540_v41 = vand.u32 4294901760, %v1539_v28 }
 0x135   : > { %v1317_v53 = vadd.f32 %v1316_v51, %v1286_v55 }
 0x137   : > { %v1248_v7 = vpop.f32.mrf.mxu2  ;;  %v1385_v58 = vpop.f32.mrf.mxu0  ;;  %v1356_v42 = vadd.f32 %v1355_v31, %v1317_v53  ;;  %v1547_v31 = vsub.f32 %v1508_v12, %v1546_v9 }
 0x138   : > { %v1249_v27 = vadd.f32 %v1248_v7, %v1176_v26  ;;  %v1541_v7 = vsub.f32 %v1539_v28, %v1540_v41 }
 0x139   : > { %v1386_v34 = vadd.f32 %v1385_v58, %v1356_v42  ;;  %v1548_v53 = vand.u32 4294901760, %v1547_v31 }
 0x13b   : > { %v1289_v8 = vpop.f32.mrf.mxu3  ;;  %v1415_v22 = vpop.f32.mrf.mxu1 }
 0x13c   : > { %v1290_v25 = vadd.f32 %v1289_v8, %v1249_v27  ;;  %v1416_v3 = vadd.f32 %v1415_v22, %v1386_v34  ;;  %v1511_v8 = vsel %vm1500_vm1, %v1495_v11, 0  ;;  %v1542_v27 = vand.u32 4294901760, %v1541_v7  ;;  %v1756_v7 = vld [vmem:[%s3198_s5] sm:$0xff] }
 0x13d   : > { %v1554_v58 = vand.u32 4294901760, %v1511_v8 }
 0x13f   : > { %v1324_v19 = vpop.f32.mrf.mxu2  ;;  %v1390_v30 = vpop.f32.mrf.mxu0 }
 0x140   : > { %v1325_v15 = vadd.f32 %v1324_v19, %v1290_v25  ;;  %v1549_v25 = vsub.f32 %v1547_v31, %v1548_v53 }
 0x143   : > { %v1359_v45 = vpop.f32.mrf.mxu3  ;;  %v1421_v47 = vpop.f32.mrf.mxu1 }
 0x144   : > { %v1360_v13 = vadd.f32 %v1359_v45, %v1325_v15  ;;  %v1555_v15 = vsub.f32 %v1511_v8, %v1554_v58  ;;  %v1550_v45 = vand.u32 4294901760, %v1549_v25 }
 0x146   : > { %v1391_v16 = vadd.f32 %v1390_v30, %v1360_v13  ;;  %v1556_v42 = vand.u32 4294901760, %v1555_v15 }
 0x147   : > { %v1448_v35 = vpop.f32.mrf.mxu2 }
 0x148   : > { %v1449_v39 = vadd.f32 %v1448_v35, %v1416_v3  ;;  %v1422_v21 = vadd.f32 %v1421_v47, %v1391_v16  ;;  %v1557_v22 = vsub.f32 %v1555_v15, %v1556_v42 }
 0x14a   : > { %v1558_v4 = vand.u32 4294901760, %v1557_v22 }
 0x14b   : > { %v1475_v48 = vpop.f32.mrf.mxu3 }
 0x14c   : > { %v3093_v32 = vadd.f32 %v1475_v48, %v1449_v39  ;;  %v1497_v39 = vld [vmem:[%s3197_s4 + $0x8] sm:$0xff] }
 0x14e   : > { %v1483_v44 = vmax.f32 %v3093_v32, 0.0 }
 0x14f   : > { %v1452_v46 = vpop.f32.mrf.mxu2 }
 0x150   : > { %v1453_v37 = vadd.f32 %v1452_v46, %v1422_v21  ;;  %v1498_v21 = vld [vmem:[%s3197_s4 + $0x10] sm:$0xff]  ;;  %v1496_v46 = vld [vmem:[%s3197_s4] sm:$0xff] }
 0x153   : > { %v1479_v56 = vpop.f32.mrf.mxu3 }
 0x154   : > { %v3096_v57 = vadd.f32 %v1479_v56, %v1453_v37 }
 0x156   : > { %v1485_v0 = vmax.f32 %v3096_v57, 0.0 }
 0x158   : > { %v1487_v43 = vadd.f32 %v1485_v0, %v1483_v44 }
 0x15a   : > { %v1488_v10 = vadd.f32 %v1487_v43, %v1486_v50 }
 0x15c   : > { %1489 = vadd.xlane.f32.xlu1 %v1488_v10 }
 0x1cf   : > { %v1490_v40 = vpop.xlane.xlu1 %1489 }
 0x1d0   : > { %v1491_v62 = vmul.f32 0.00390625, %v1490_v40 }
 0x1d2   : > { %v1528_v51 = vand.u32 4294901760, %v1491_v62 }
 0x1d4   : > { %v1579_v49 = vsub.f32 %v1491_v62, %v1528_v51  ;;  %1529 = vmatpush.msra.mxu0 %v1528_v51  ;;  %1656 = vmatpush.msrb.mxu3 %v1528_v51 }
 0x1d5   : > { %1535 = vmatmul.f32.vlgmr.msra.gmra.mxu0 %v1534_v52  ;;  %1660 = vmatmul.f32.vlgmr.msrb.gmra.mxu3 %v1532_v14 }
 0x1d6   : > { %v1580_v26 = vand.u32 4294901760, %v1579_v49  ;;  %1618 = vmatpush.msrb.mxu2 %v1579_v49 }
 0x1d7   : > { %1621 = vmatmul.f32.vlgmr.msrb.gmra.mxu2 %v1531_v63 }
 0x1d8   : > { %v1581_v55 = vsub.f32 %v1579_v49, %v1580_v26  ;;  %1700 = vmatpush.msrb.mxu0 %v1580_v26 }
 0x1da   : > { %v1582_v19 = vand.u32 4294901760, %v1581_v55 }
 0x1dc   : > { %1583 = vmatpush.msra.mxu1 %v1582_v19  ;;  %v1762_v19 = vsel %vm1760_vm2, %v1756_v7, 0  ;;  %v1759_v7 = vld [vmem:[%s3199_s6 + $0x8] sm:$0xff] }
 0x1dd   : > { %1543 = vmatmul.f32.gmra.mxu0 %v1542_v27  ;;  %1585 = vmatmul.f32.vlgmr.msra.gmra.mxu1 %v1530_v24 }
 0x1de   : > { %1734 = vmatpush.msrb.mxu1 %v1528_v51  ;;  %1666 = vmatmul.f32.gmra.mxu3 %v1540_v41 }
 0x1df   : > { %1626 = vmatmul.f32.gmra.mxu2 %v1539_v28 }
 0x1e5   : > { %1551 = vmatmul.f32.gmra.mxu0 %v1550_v45  ;;  %1589 = vmatmul.f32.gmra.mxu1 %v1538_v18 }
 0x1e6   : > { %1672 = vmatmul.f32.gmra.mxu3 %v1548_v53 }
 0x1e7   : > { %1631 = vmatmul.f32.gmra.mxu2 %v1547_v31 }
 0x1ed   : > { %1559 = vmatmul.f32.gmra.mxu0 %v1558_v4  ;;  %1593 = vmatmul.f32.gmra.mxu1 %v1546_v9 }
 0x1ee   : > { %1678 = vmatmul.f32.gmra.mxu3 %v1556_v42  ;;  %v1787_v42 = vand.u32 4294901760, %v1762_v19 }
 0x1ef   : > { %1636 = vmatmul.f32.gmra.mxu2 %v1555_v15 }
 0x1f5   : > { %1597 = vmatmul.f32.gmra.mxu1 %v1554_v58  ;;  %1702 = vmatmul.f32.vlgmr.msrb.gmra.mxu0 %v1530_v24 }
 0x1fd   : > { %1706 = vmatmul.f32.gmra.mxu0 %v1538_v18  ;;  %1736 = vmatmul.f32.vlgmr.msrb.gmra.mxu1 %v1530_v24 }
 0x205   : > { %1710 = vmatmul.f32.gmra.mxu0 %v1546_v9  ;;  %1740 = vmatmul.f32.gmra.mxu1 %v1538_v18 }
 0x20d   : > { %1714 = vmatmul.f32.gmra.mxu0 %v1554_v58  ;;  %1744 = vmatmul.f32.gmra.mxu1 %v1546_v9 }
 0x215   : > { %1748 = vmatmul.f32.gmra.mxu1 %v1554_v58 }
 0x252   : > { %v1536_v13 = vpop.f32.mrf.mxu0 }
 0x253   : > { %v1537_v10 = vadd.f32 %v1536_v13, %v1496_v46 }
 0x258   : > { %v1661_v29 = vpop.f32.mrf.mxu3 }
 0x25a   : > { %v1544_v33 = vpop.f32.mrf.mxu0  ;;  %v1586_v34 = vpop.f32.mrf.mxu1 }
 0x25b   : > { %v1622_v17 = vpop.f32.mrf.mxu2  ;;  %v1545_v50 = vadd.f32 %v1544_v33, %v1497_v39  ;;  %v1587_v63 = vadd.f32 %v1586_v34, %v1537_v10 }
 0x25d   : > { %v1623_v12 = vadd.f32 %v1622_v17, %v1587_v63  ;;  %v1788_v17 = vsub.f32 %v1762_v19, %v1787_v42 }
 0x25f   : > { %v1662_v9 = vadd.f32 %v1661_v29, %v1623_v12  ;;  %v1789_v39 = vand.u32 4294901760, %v1788_v17 }
 0x261   : > { %v1667_v36 = vpop.f32.mrf.mxu3 }
 0x262   : > { %v1552_v30 = vpop.f32.mrf.mxu0  ;;  %v1590_v35 = vpop.f32.mrf.mxu1 }
 0x263   : > { %v1627_v61 = vpop.f32.mrf.mxu2  ;;  %v1553_v43 = vadd.f32 %v1552_v30, %v1498_v21  ;;  %v1591_v59 = vadd.f32 %v1590_v35, %v1545_v50  ;;  %v1757_v35 = vld [vmem:[%s3198_s5 + $0x8] sm:$0xff] }
 0x265   : > { %v1628_v18 = vadd.f32 %v1627_v61, %v1591_v59 }
 0x267   : > { %v1668_v40 = vadd.f32 %v1667_v36, %v1628_v18 }
 0x269   : > { %v1673_v60 = vpop.f32.mrf.mxu3 }
 0x26a   : > { %v1560_v16 = vpop.f32.mrf.mxu0  ;;  %v1594_v48 = vpop.f32.mrf.mxu1 }
 0x26b   : > { %v1632_v6 = vpop.f32.mrf.mxu2  ;;  %v1595_v24 = vadd.f32 %v1594_v48, %v1553_v43  ;;  %v1561_v23 = vadd.f32 %v1560_v16, %v1499_v1  ;;  %v1790_v43 = vsub.f32 %v1788_v17, %v1789_v39 }
 0x26d   : > { %v1633_v20 = vadd.f32 %v1632_v6, %v1595_v24 }
 0x26f   : > { %v1674_v62 = vadd.f32 %v1673_v60, %v1633_v20 }
 0x271   : > { %v1679_v27 = vpop.f32.mrf.mxu3 }
 0x272   : > { %v1598_v3 = vpop.f32.mrf.mxu1  ;;  %v1703_v47 = vpop.f32.mrf.mxu0 }
 0x273   : > { %v1599_v52 = vadd.f32 %v1598_v3, %v1561_v23  ;;  %v1637_v41 = vpop.f32.mrf.mxu2  ;;  %v1704_v31 = vadd.f32 %v1703_v47, %v1662_v9  ;;  %v1765_v3 = vsel %vm1760_vm2, %v1757_v35, 0 }
 0x275   : > { %v1638_v26 = vadd.f32 %v1637_v41, %v1599_v52 }
 0x277   : > { %v1680_v15 = vadd.f32 %v1679_v27, %v1638_v26 }
 0x27a   : > { %v1707_v37 = vpop.f32.mrf.mxu0  ;;  %v1737_v56 = vpop.f32.mrf.mxu1 }
 0x27b   : > { %v1708_v51 = vadd.f32 %v1707_v37, %v1668_v40  ;;  %v1738_v53 = vadd.f32 %v1737_v56, %v1704_v31  ;;  %v1795_v37 = vand.u32 4294901760, %v1765_v3 }
 0x27d   : > { %v1752_v22 = vmax.f32 %v1738_v53, 0.0  ;;  %v1796_v24 = vsub.f32 %v1765_v3, %v1795_v37 }
 0x27f   : > { %v1785_v16 = vand.u32 4294901760, %v1752_v22  ;;  %v1797_v23 = vand.u32 4294901760, %v1796_v24 }
 0x281   : > { %v1835_v21 = vsub.f32 %v1752_v22, %v1785_v16  ;;  %v1798_v12 = vsub.f32 %v1796_v24, %v1797_v23 }
 0x282   : > { %v1741_v14 = vpop.f32.mrf.mxu1  ;;  %v1711_v28 = vpop.f32.mrf.mxu0 }
 0x283   : > { %v1712_v11 = vadd.f32 %v1711_v28, %v1674_v62  ;;  %v1742_v8 = vadd.f32 %v1741_v14, %v1708_v51  ;;  %v1836_v59 = vand.u32 4294901760, %v1835_v21  ;;  %v1791_v14 = vand.u32 4294901760, %v1790_v43  ;;  %v1758_v51 = vld [vmem:[%s3199_s6] sm:$0xff] }
 0x284   : > { %v1799_v40 = vand.u32 4294901760, %v1798_v12 }
 0x285   : > { %v1753_v45 = vmax.f32 %v1742_v8, 0.0  ;;  %v1837_v18 = vsub.f32 %v1835_v21, %v1836_v59 }
 0x287   : > { %v1783_v34 = vand.u32 4294901760, %v1753_v45  ;;  %v1838_v28 = vand.u32 4294901760, %v1837_v18 }
 0x289   : > { %v1829_v47 = vsub.f32 %v1753_v45, %v1783_v34 }
 0x28a   : > { %v1745_v49 = vpop.f32.mrf.mxu1  ;;  %v1715_v25 = vpop.f32.mrf.mxu0 }
 0x28b   : > { %v1746_v55 = vadd.f32 %v1745_v49, %v1712_v11  ;;  %v1716_v4 = vadd.f32 %v1715_v25, %v1680_v15  ;;  %v1830_v50 = vand.u32 4294901760, %v1829_v47 }
 0x28d   : > { %v1754_v58 = vmax.f32 %v1746_v55, 0.0  ;;  %v1831_v63 = vsub.f32 %v1829_v47, %v1830_v50 }
 0x28f   : > { %v1781_v13 = vand.u32 4294901760, %v1754_v58  ;;  %v1832_v20 = vand.u32 4294901760, %v1831_v63 }
 0x291   : > { %v1823_v48 = vsub.f32 %v1754_v58, %v1781_v13 }
 0x292   : > { %v1749_v33 = vpop.f32.mrf.mxu1 }
 0x293   : > { %v1750_v30 = vadd.f32 %v1749_v33, %v1716_v4  ;;  %v1824_v46 = vand.u32 4294901760, %v1823_v48 }
 0x295   : > { %v1755_v29 = vmax.f32 %v1750_v30, 0.0  ;;  %v1825_v6 = vsub.f32 %v1823_v48, %v1824_v46 }
 0x297   : > { %v1779_v61 = vand.u32 4294901760, %v1755_v29  ;;  %v1826_v60 = vand.u32 4294901760, %v1825_v6 }
 0x299   : > { %v1817_v36 = vsub.f32 %v1755_v29, %v1779_v61  ;;  %1780 = vmatpush.msra.mxu2 %v1779_v61  ;;  %1967 = vmatpush.msra.mxu1 %v1779_v61 }
 0x29b   : > { %v1818_v56 = vand.u32 4294901760, %v1817_v36  ;;  %1782 = vmatpush.msra.mxu2 %v1781_v13  ;;  %1969 = vmatpush.msra.mxu1 %v1781_v13 }
 0x29d   : > { %v1819_v10 = vsub.f32 %v1817_v36, %v1818_v56  ;;  %1784 = vmatpush.msra.mxu2 %v1783_v34  ;;  %1932 = vmatpush.msra.mxu0 %v1818_v56 }
 0x29e   : > { %1971 = vmatpush.msra.mxu1 %v1783_v34 }
 0x29f   : > { %1786 = vmatpush.msra.mxu2 %v1785_v16  ;;  %1936 = vmatpush.msra.mxu0 %v1824_v46  ;;  %v1820_v1 = vand.u32 4294901760, %v1819_v10 }
 0x2a0   : > { %1973 = vmatpush.msra.mxu1 %v1785_v16  ;;  %1792 = vmatmul.f32.vlgmr.msra.gmra.mxu2 %v1791_v14 }
 0x2a1   : > { %1863 = vmatpush.msrb.mxu2 %v1817_v36  ;;  %1821 = vmatpush.msra.mxu3 %v1820_v1 }
 0x2a2   : > { %1940 = vmatpush.msra.mxu0 %v1830_v50  ;;  %1975 = vmatmul.f32.vlgmr.msra.gmra.mxu1 %v1787_v42 }
 0x2a3   : > { %1866 = vmatpush.msrb.mxu2 %v1823_v48  ;;  %1827 = vmatpush.msra.mxu3 %v1826_v60 }
 0x2a4   : > { %1944 = vmatpush.msra.mxu0 %v1836_v59 }
 0x2a5   : > { %1869 = vmatpush.msrb.mxu2 %v1829_v47  ;;  %1946 = vmatmul.f32.vlgmr.msra.gmra.mxu0 %v1787_v42 }
 0x2a6   : > { %1833 = vmatpush.msra.mxu3 %v1832_v20 }
 0x2a7   : > { %1872 = vmatpush.msrb.mxu2 %v1835_v21 }
 0x2a8   : > { %1839 = vmatpush.msra.mxu3 %v1838_v28  ;;  %1800 = vmatmul.f32.gmra.mxu2 %v1799_v40 }
 0x2a9   : > { %1841 = vmatmul.f32.vlgmr.msra.gmra.mxu3 %v1787_v42 }
 0x2aa   : > { %1897 = vmatpush.msrb.mxu3 %v1779_v61  ;;  %1979 = vmatmul.f32.gmra.mxu1 %v1795_v37 }
 0x2ac   : > { %1899 = vmatpush.msrb.mxu3 %v1781_v13 }
 0x2ad   : > { %1950 = vmatmul.f32.gmra.mxu0 %v1795_v37 }
 0x2ae   : > { %1901 = vmatpush.msrb.mxu3 %v1783_v34 }
 0x2b0   : > { %1903 = vmatpush.msrb.mxu3 %v1785_v16  ;;  %1875 = vmatmul.f32.vlgmr.msrb.gmra.mxu2 %v1788_v17 }
 0x2b1   : > { %1845 = vmatmul.f32.gmra.mxu3 %v1795_v37 }
 0x2b8   : > { %1880 = vmatmul.f32.gmra.mxu2 %v1796_v24 }
 0x2b9   : > { %1907 = vmatmul.f32.vlgmr.msrb.gmra.mxu3 %v1789_v39 }
 0x2c1   : > { %1913 = vmatmul.f32.gmra.mxu3 %v1797_v23 }
 0x31f   : > { %v1976_v8 = vpop.f32.mrf.mxu1 }
 0x322   : > { %v1947_v31 = vpop.f32.mrf.mxu0 }
 0x323   : > { %v1793_v62 = vpop.f32.mrf.mxu2 }
 0x324   : > { %v1794_v11 = vadd.f32 %v1793_v62, %v1758_v51 }
 0x327   : > { %v1980_v13 = vpop.f32.mrf.mxu1 }
 0x32a   : > { %v1951_v42 = vpop.f32.mrf.mxu0 }
 0x32b   : > { %v1801_v41 = vpop.f32.mrf.mxu2 }
 0x32c   : > { %v1842_v52 = vpop.f32.mrf.mxu3  ;;  %v1802_v27 = vadd.f32 %v1801_v41, %v1759_v7 }
 0x32d   : > { %v1843_v55 = vadd.f32 %v1842_v52, %v1794_v11 }
 0x333   : > { %v1876_v49 = vpop.f32.mrf.mxu2 }
 0x334   : > { %v1846_v9 = vpop.f32.mrf.mxu3  ;;  %v1877_v53 = vadd.f32 %v1876_v49, %v1843_v55 }
 0x335   : > { %v1847_v58 = vadd.f32 %v1846_v9, %v1802_v27 }
 0x33b   : > { %v1881_v25 = vpop.f32.mrf.mxu2 }
 0x33c   : > { %v1908_v26 = vpop.f32.mrf.mxu3  ;;  %v1882_v15 = vadd.f32 %v1881_v25, %v1847_v58 }
 0x33d   : > { %v1909_v19 = vadd.f32 %v1908_v26, %v1877_v53 }
 0x33f   : > { %v1948_v22 = vadd.f32 %v1947_v31, %v1909_v19 }
 0x341   : > { %v1977_v34 = vadd.f32 %v1976_v8, %v1948_v22 }
 0x344   : > { %v1914_v45 = vpop.f32.mrf.mxu3 }
 0x345   : > { %v1915_v4 = vadd.f32 %v1914_v45, %v1882_v15 }
 0x347   : > { %v1952_v33 = vadd.f32 %v1951_v42, %v1915_v4 }
 0x349   : > { %v1981_v30 = vadd.f32 %v1980_v13, %v1952_v33 }
 0x34b   : > { %v1983_v35 = vsub.f32 %v1981_v30, %v1977_v34 }
 0x34d   : > { %v1984_v17 = vmul.f32 1.442695, %v1983_v35 }
 0x34f   : > { %2179 = vpow2.f32 %v1984_v17 }
 0x355   : > { %v2180_v16 = vpop.eup %2179 }
 0x356   : > { %v1986_v48 = vadd.f32 1.0, %v2180_v16 }
 0x358   : > { %2181 = vrcp.f32 %v1986_v48  ;;  %v1998_v61 = vand.u32 2147483648, %v1986_v48  ;;  %v1996_v21 = vand.u32 2147483647, %v1986_v48  ;;  %vm1992_vm4 = vweird.f32 %v1986_v48 }
 0x35a   : > { %v1999_v46 = vor.u32 1.1754944e-38, %v1998_v61  ;;  %vm1997_vm6 = vcmp.eq.f32.partialorder %v1996_v21, 8.507059e+37 }
 0x35e   : > { %v2182_v29 = vpop.eup %2181 }
 0x35f   : > { %v1988_v3 = vmul.f32 %v2182_v29, %v1986_v48  ;;  %vm1993_vm3 = vweird.f32 %v2182_v29 }
 0x360   : > { %vm1994_vm5 = vmor %vm1992_vm4, %vm1993_vm3 }
 0x361   : > { %v1989_v47 = vsub.f32 1.0, %v1988_v3 }
 0x363   : > { %v1990_v39 = vmul.f32 %v2182_v29, %v1989_v47 }
 0x365   : > { %v1991_v36 = vadd.f32 %v2182_v29, %v1990_v39 }
 0x367   : > { %v1995_v37 = vsel %vm1994_vm5, %v2182_v29, %v1991_v36 }
 0x368   : > { %v2000_v56 = vsel %vm1997_vm6, %v1999_v46, %v1995_v37 }
 0x369   : > { %2004 = vperm.xlu1 %2177, %v2000_v56   ;;  %v2009_v50 = vsub.f32 1.0, %v2000_v56 }
 0x36b   : > { %2012 = vperm.xlu2 %2178, %v2009_v50  }
 0x3c5   : > { %v2013_v43 = vpop.permute.xlu2 %2012 }
 0x3c6   : > { %v2015_v6 = vmul.f32 %v2013_v43, %v1484_v5  ;;  %v2016_v59 = vmul.f32 %v2013_v43, %v1485_v0 }
 0x3db   : > { %v2005_v10 = vpop.permute.xlu1 %2004 }
 0x3dc   : > { %v2007_v24 = vmul.f32 %v2005_v10, %v1482_v38  ;;  %v2008_v1 = vmul.f32 %v2005_v10, %v1483_v44 }
 0x3de   : > { %v2017_v63 = vadd.f32 %v2015_v6, %v2007_v24  ;;  %v2018_v60 = vadd.f32 %v2016_v59, %v2008_v1 }
 0x3e0   : > { %2019 = vst [vmem:[%s298_s28] sm:$0xff] %v2017_v63 }
 0x3e1   : > { %2020 = vst [vmem:[%s298_s28 + $0x8] sm:$0xff] %v2018_v60 }
 0x3e2   : > { %2240 = shalt.err (!%p2237_p7)
}
 0x3e3   : > { %2129 = dma.vmem_to_hbm [thread:$0]  (%p2370_p11), %s2036_s16, 256, %s2038_s26, %s2022_s10  }
 0x3e4 PF: > { %s2049_s19 = sand.u32 1, %s2267_s24   ;;  %p2136_p8 = pnand %p2110_p9, %p2374_p12 }
 0x3e5   : > { %s2050_s9 = scalar_lea.sflag [#allocation4], %s2049_s19 }
 0x3e6   : > { %p2137_p10 = pneg %p2136_p8 }
 0x3e8   : > { %2262 = dma.done.wait (%p2137_p10), %s2050_s9, 256  }
 0x3e9   : > { %2264 = vsyncadd (%p2137_p10), %s2050_s9, 4294967040  ;;  %s3253_s15 = sld [smem:[#allocation8_spill]]  ;;  %p20_p0 = scmp.ge.s32.totalorder %s2349_s30, 4  }
 0x3ea   : > { %s3254_s26 = sld [smem:[#allocation9_spill]]  ;;  %s3255_s24 = smov %s2271_s25 }
 0x3eb   : > { %s3257_s27 = smov %s2349_s30  ;;  %22 = sbr.rel (!%p20_p0) target bundleno = 5 (0x5), region = 93 }
 0x3ef   : > { %s3256_s25 = smov %s3253_s15 }
 0x3f0   :  { %2056 = vsyncpa [#allocation3], 1 }
 0x3f1   :  { %2058 = vsyncpa [#allocation3 + $0x1], 1 }
 0x3f2   :  { %2059 = vsyncpa [#allocation4], 1 }
 0x3f3   :  { %2061 = vsyncpa [#allocation4 + $0x1], 1 }

</bundles_post_ra>
